<compile_context>
chip_gen: v7x
topology: tpu7x:2x2x1
jax: 0.10.0
libtpu: 0.0.40
codegen_flags: <defaults>
</compile_context>

<pallas_src>
import jax
import jax.numpy as jnp
from jax.experimental import pallas as pl
from jax.experimental.pallas import tpu as pltpu

_LANE = 128
_SUBLANE = 8


def _round_up(n, m):
    return ((n + m - 1) // m) * m


def _make_rhn_kernel(L, TT, BB, Hp, Dp, compute_dtype):
    """Kernel for fixed (static) block sizes."""
    H3 = 3 * Hp
    cdt = compute_dtype

    def kernel(x_ref, h0_ref, wx_ref, bx_ref, r_ref, br_ref, wo_ref, bo_ref,
               o_ref, h_scr, xp_scr):
        # x_ref:  (TT, BB, Dp)    time-major input tile        (compute_dtype)
        # h0_ref: (BB, Hp)        initial hidden state         (f32)
        # wx_ref: (Dp, 3Hp)       [W_H | W_C | W_T]^T          (compute_dtype)
        # bx_ref: (1, 3Hp)        input bias + tick-0 recurrent bias (folded)
        # r_ref:  (L, Hp, 3Hp)    per-tick [R_H | R_C | R_T]^T (compute_dtype)
        # br_ref: (L, 1, 3Hp)     per-tick recurrent bias (index 0 unused)
        # wo_ref: (Hp, Hp)        out_embedding.weight^T       (compute_dtype)
        # bo_ref: (1, Hp)
        # o_ref:  (L, TT, BB, Hp) output tile (also used as the hidden stash)
        # h_scr:  (BB, Hp)        hidden carried across time tiles
        # xp_scr: (TT, BB, 3Hp)   staged input projection for this tile

        # Re-initialise the carried hidden at the FIRST time tile of every
        # batch block (time axis is program_id(1); batch axis is "parallel").
        @pl.when(pl.program_id(1) == 0)
        def _():
            h_scr[...] = h0_ref[...]

        # ---- input projection for the whole tile: one wide MXU matmul ------
        xp = jnp.dot(x_ref[...].reshape(TT * BB, Dp), wx_ref[...],
                     preferred_element_type=jnp.float32)
        xp_scr[...] = (xp + bx_ref[...]).reshape(TT, BB, H3)

        # ---- hoist loop-invariant weights / pre-broadcast biases -----------
        r_w = tuple(r_ref[l] for l in range(L))
        br_b = [None] + [jnp.broadcast_to(br_ref[l], (BB, H3))
                         for l in range(1, L)]
        # TODO(synk): for very large H keep `r` in HBM (memory_space=pl.ANY)
        # and double-buffer one (Hp, 3Hp) tick slab with make_async_copy, or
        # latch it in the MXU via pltpu.matmul_push_rhs / matmul_acc_lhs.

        # ---- sequential recurrence over time (constant live set) -----------
        def step(s, h):
            xs = xp_scr[s]                                   # (BB, 3Hp) aligned
            for l in range(L):                               # tiny tick loop
                proj = jnp.dot(h.astype(cdt), r_w[l],
                               preferred_element_type=jnp.float32)
                proj = proj + (xs if l == 0 else br_b[l])
                hl = proj[:, :Hp]
                tl = proj[:, Hp:2 * Hp]
                cl = proj[:, 2 * Hp:]
                h = hl * tl + h * cl                         # gates in f32
                # Stash the raw hidden; out_embedding is applied afterwards.
                o_ref[l, pl.ds(s, 1), :, :] = h[None, :, :]  # dense (BB,Hp) tile
            return h

        h_scr[...] = jax.lax.fori_loop(0, TT, step, h_scr[...])

        # ---- out_embedding on every (tick, step) hidden in ONE matmul ------
        hv = o_ref[...].reshape(L * TT * BB, Hp)
        out = jnp.dot(hv.astype(cdt), wo_ref[...],
                      preferred_element_type=jnp.float32) + bo_ref[...]
        o_ref[...] = out.reshape(L, TT, BB, Hp)

    return kernel


def recurrent_highway(x, params, *, layers, hidden=None, time_tile=None,
                      batch_block=None, compute_dtype=jnp.float32,
                      vmem_limit_bytes=None):
    """Pallas forward of RecurrentHighway.

    x: (B, T, Din) float32.  Returns (B, T, layers * hidden_size) float32.
    compute_dtype: dtype fed to the MXU (use jnp.bfloat16 on v6e/v7x for
    ~2x MXU throughput and half the weight VMEM; accumulation stays f32).
    """
    B, T, Din = x.shape
    H = params["W_out"].shape[0]
    L = layers
    f32 = jnp.float32
    cdt = compute_dtype

    # Lane/sublane padding (feedback: lane-dense gate slices + unmasked stores).
    Hp = _round_up(H, _LANE)
    Dp = _round_up(Din, _LANE)
    if batch_block is None:
        BB = _round_up(B, _SUBLANE)
    else:
        assert batch_block % _SUBLANE == 0
        BB = batch_block
    Bp = _round_up(B, BB)

    TT = T if time_tile is None else time_tile
    assert T % TT == 0, "time_tile must divide T"

    # ---- pack + pad weights (K-major; per-gate lane padding) ---------------
    def pad2(w, r, c):
        return jnp.pad(w, ((0, r - w.shape[0]), (0, c - w.shape[1])))

    def padv(v, n):
        return jnp.pad(v, (0, n - v.shape[0]))

    wx = jnp.concatenate(
        [pad2(params["W_H"].T.astype(f32), Dp, Hp),
         pad2(params["W_C"].T.astype(f32), Dp, Hp),
         pad2(params["W_T"].T.astype(f32), Dp, Hp)], axis=1).astype(cdt)
    # Fold the tick-0 recurrent bias into the input-projection bias.
    bx = jnp.concatenate(
        [padv((params["b_WH"] + params["b_RH"][0]).astype(f32), Hp),
         padv((params["b_WC"] + params["b_RC"][0]).astype(f32), Hp),
         padv((params["b_WT"] + params["b_RT"][0]).astype(f32), Hp)],
    ).reshape(1, 3 * Hp)

    def pad_r(w):  # (L, H, H) -> (L, Hp, Hp), transposed per tick
        w = jnp.transpose(w, (0, 2, 1)).astype(f32)
        return jnp.pad(w, ((0, 0), (0, Hp - H), (0, Hp - H)))

    r = jnp.concatenate([pad_r(params["R_H"]), pad_r(params["R_C"]),
                         pad_r(params["R_T"])], axis=2).astype(cdt)

    def pad_bl(b):  # (L, H) -> (L, Hp)
        return jnp.pad(b.astype(f32), ((0, 0), (0, Hp - H)))

    br = jnp.concatenate([pad_bl(params["b_RH"]), pad_bl(params["b_RC"]),
                          pad_bl(params["b_RT"])], axis=1).reshape(L, 1, 3 * Hp)

    wo = pad2(params["W_out"].T.astype(f32), Hp, Hp).astype(cdt)
    bo = padv(params["b_out"].astype(f32), Hp).reshape(1, Hp)

    # ---- time-major, padded activations ------------------------------------
    xt = jnp.transpose(x.astype(f32), (1, 0, 2))                 # (T, B, Din)
    xt = jnp.pad(xt, ((0, 0), (0, Bp - B), (0, Dp - Din))).astype(cdt)

    if hidden is None:
        h0 = jnp.zeros((Bp, Hp), f32)                            # init_state()
    else:
        h0 = jnp.pad(hidden.astype(f32), ((0, Bp - B), (0, Hp - H)))

    kernel = _make_rhn_kernel(L, TT, BB, Hp, Dp, cdt)

    # NOTE: the constant-index-map operands (weights/biases/h0) could be
    # single-buffered with pipeline_mode=pl.Buffered(1) to halve their VMEM
    # footprint on v7x; left at the default here.
    out = pl.pallas_call(
        kernel,
        out_shape=jax.ShapeDtypeStruct((L, T, Bp, Hp), jnp.float32),
        grid_spec=pltpu.PrefetchScalarGridSpec(
            num_scalar_prefetch=0,
            grid=(Bp // BB, T // TT),                 # (batch-parallel, time)
            in_specs=[
                pl.BlockSpec((TT, BB, Dp), lambda b, t: (t, b, 0)),     # x
                pl.BlockSpec((BB, Hp), lambda b, t: (b, 0)),            # h0
                pl.BlockSpec((Dp, 3 * Hp), lambda b, t: (0, 0)),        # wx
                pl.BlockSpec((1, 3 * Hp), lambda b, t: (0, 0)),         # bx
                pl.BlockSpec((L, Hp, 3 * Hp), lambda b, t: (0, 0, 0)),  # r
                pl.BlockSpec((L, 1, 3 * Hp), lambda b, t: (0, 0, 0)),   # br
                pl.BlockSpec((Hp, Hp), lambda b, t: (0, 0)),            # wo
                pl.BlockSpec((1, Hp), lambda b, t: (0, 0)),             # bo
            ],
            out_specs=pl.BlockSpec((L, TT, BB, Hp), lambda b, t: (0, t, b, 0)),
            scratch_shapes=[
                pltpu.VMEM((BB, Hp), jnp.float32),          # carried hidden
                pltpu.VMEM((TT, BB, 3 * Hp), jnp.float32),  # staged input proj
            ],
        ),
        compiler_params=pltpu.CompilerParams(
            # batch blocks are independent (megacore); time carries the
            # recurrence and must run in order.
            dimension_semantics=("parallel", "arbitrary"),
            vmem_limit_bytes=vmem_limit_bytes,
        ),
    )(xt, h0, wx, bx, r, br, wo, bo)

    # (L, T, Bp, Hp) -> strip padding -> (B, T, L*H)
    out = out[:, :, :B, :H]
    return jnp.transpose(out, (2, 1, 0, 3)).reshape(B, T, L * H)


def _reference(x, p, L, *, mxu_dtype=None):
    """Pure-JAX replica of the PyTorch forward (hidden=None -> zeros).

    mxu_dtype=None      -> exact f32 matmuls (Precision.HIGHEST).
    mxu_dtype=bfloat16  -> mimic a single-pass bf16 MXU with f32 accumulation.
    """
    B, T, Din = x.shape
    H = p["W_out"].shape[0]
    if mxu_dtype is None:
        lin = lambda w, b, v: jnp.dot(
            v, w.T, precision=jax.lax.Precision.HIGHEST) + b
    else:
        lin = lambda w, b, v: jnp.dot(
            v.astype(mxu_dtype), w.T.astype(mxu_dtype),
            preferred_element_type=jnp.float32) + b
    h = jnp.zeros((B, H), jnp.float32)
    time_outs = []
    for t in range(T):
        xt = x[:, t, :]
        tick_outs = []
        for l in range(L):
            hl = lin(p["R_H"][l], p["b_RH"][l], h)
            tl = lin(p["R_C"][l], p["b_RC"][l], h)
            cl = lin(p["R_T"][l], p["b_RT"][l], h)
            if l == 0:
                hl = hl + lin(p["W_H"], p["b_WH"], xt)
                tl = tl + lin(p["W_C"], p["b_WC"], xt)
                cl = cl + lin(p["W_T"], p["b_WT"], xt)
            h = hl * tl + h * cl
            tick_outs.append(lin(p["W_out"], p["b_out"], h))
        time_outs.append(jnp.concatenate(tick_outs, axis=-1)[:, None, :])
    return jnp.concatenate(time_outs, axis=1)


if __name__ == "__main__":
    B, T, Din, H, L = 2, 8, 32, 32, 3

    key = jax.random.PRNGKey(0)
    keys = jax.random.split(key, 15)
    bi = 1.0 / (Din ** 0.5)
    bh = 1.0 / (H ** 0.5)
    u = lambda k, shp, b: jax.random.uniform(k, shp, jnp.float32, -b, b)

    params = dict(
        W_H=u(keys[0], (H, Din), bi),   b_WH=u(keys[1], (H,), bi),
        W_C=u(keys[2], (H, Din), bi),   b_WC=u(keys[3], (H,), bi),
        W_T=u(keys[4], (H, Din), bi),   b_WT=u(keys[5], (H,), bi),
        R_H=u(keys[6], (L, H, H), bh),  b_RH=u(keys[7], (L, H), bh),
        R_C=u(keys[8], (L, H, H), bh),  b_RC=u(keys[9], (L, H), bh),
        R_T=u(keys[10], (L, H, H), bh), b_RT=u(keys[11], (L, H), bh),
        W_out=u(keys[12], (H, H), bh),  b_out=u(keys[13], (H,), bh),
    )
    x = jax.random.normal(keys[14], (B, T, Din), dtype=jnp.float32)

    # f32 compute path.
    out = jax.block_until_ready(recurrent_highway(x, params, layers=L))
    assert out.shape == (B, T, L * H), out.shape

    # Validate against BOTH an exact-f32 reference and a bf16-MXU reference:
    # the kernel must match whichever rounding mode the MXU used for its f32
    # matmuls.  A real wiring bug (wrong gate / missing bias) is O(0.1+).
    ref_f32 = _reference(x, params, L)
    ref_bf16 = _reference(x, params, L, mxu_dtype=jnp.bfloat16)
    err_f32 = float(jnp.max(jnp.abs(out - ref_f32)))
    err_bf16 = float(jnp.max(jnp.abs(out - ref_bf16)))
    assert min(err_f32, err_bf16) < 5e-3, (err_f32, err_bf16)

    # bf16 fast path (recommended on v6e/v7x): compare against the bf16-MXU
    # reference (same operand roundings, f32 accumulation).
    out_bf = jax.block_until_ready(
        recurrent_highway(x, params, layers=L, compute_dtype=jnp.bfloat16))
    assert out_bf.shape == (B, T, L * H), out_bf.shape
    err_bf = float(jnp.max(jnp.abs(out_bf - ref_bf16)))
    assert err_bf < 1e-2, err_bf

    print("KERNEL_OK")
</pallas_src>

<mosaic_0001>
module attributes {stable_mosaic.version = 11 : i64} {
  func.func @kernel(%arg0: i32, %arg1: i32, %arg2: memref<8x8x128xf32, #tpu.memory_space<vmem>>, %arg3: memref<8x128xf32, #tpu.memory_space<vmem>>, %arg4: memref<128x384xf32, #tpu.memory_space<vmem>>, %arg5: memref<1x384xf32, #tpu.memory_space<vmem>>, %arg6: memref<3x128x384xf32, #tpu.memory_space<vmem>>, %arg7: memref<3x1x384xf32, #tpu.memory_space<vmem>>, %arg8: memref<128x128xf32, #tpu.memory_space<vmem>>, %arg9: memref<1x128xf32, #tpu.memory_space<vmem>>, %arg10: memref<3x8x8x128xf32, #tpu.memory_space<vmem>>, %arg11: memref<8x128xf32, #tpu.memory_space<vmem>>, %arg12: memref<8x8x384xf32, #tpu.memory_space<vmem>>) attributes {dimension_semantics = [#tpu.dimension_semantics<parallel>, #tpu.dimension_semantics<arbitrary>], iteration_bounds = array<i64: 1, 1>, scalar_prefetch = 0 : i64, scratch_operands = 2 : i64, tpu.core_type = #tpu.core_type<tc>, window_params = [{transform_indices = @transform_0, window_bounds = array<i64: 8, 8, 128>}, {transform_indices = @transform_1, window_bounds = array<i64: 8, 128>}, {pipeline_mode = #tpu.pipeline_mode<synchronous>, transform_indices = @transform_2, window_bounds = array<i64: 128, 384>}, {pipeline_mode = #tpu.pipeline_mode<synchronous>, transform_indices = @transform_3, window_bounds = array<i64: 1, 384>}, {pipeline_mode = #tpu.pipeline_mode<synchronous>, transform_indices = @transform_4, window_bounds = array<i64: 3, 128, 384>}, {pipeline_mode = #tpu.pipeline_mode<synchronous>, transform_indices = @transform_5, window_bounds = array<i64: 3, 1, 384>}, {pipeline_mode = #tpu.pipeline_mode<synchronous>, transform_indices = @transform_6, window_bounds = array<i64: 128, 128>}, {pipeline_mode = #tpu.pipeline_mode<synchronous>, transform_indices = @transform_7, window_bounds = array<i64: 1, 128>}, {transform_indices = @transform_8, window_bounds = array<i64: 3, 8, 8, 128>}]} {
    %c0_i32 = arith.constant 0 : i32
    %0 = arith.cmpi eq, %arg1, %c0_i32 : i32
    %1 = arith.extui %0 : i1 to i32
    %c0_i32_0 = arith.constant 0 : i32
    %2 = arith.cmpi ne, %1, %c0_i32_0 : i32
    scf.if %2 {
      %c0_42 = arith.constant 0 : index
      %c0_43 = arith.constant 0 : index
      %39 = vector.load %arg3[%c0_42, %c0_43] : memref<8x128xf32, #tpu.memory_space<vmem>>, vector<8x128xf32>
      %c0_44 = arith.constant 0 : index
      %c0_45 = arith.constant 0 : index
      %40 = vector.load %arg11[%c0_44, %c0_45] : memref<8x128xf32, #tpu.memory_space<vmem>>, vector<8x128xf32>
      tpu.vector_store %arg11[%c0_44, %c0_45], %39 {strides = array<i32>} : memref<8x128xf32, #tpu.memory_space<vmem>>, vector<8x128xf32>,
    } else {
    }
    %c0 = arith.constant 0 : index
    %c0_1 = arith.constant 0 : index
    %c0_2 = arith.constant 0 : index
    %3 = vector.load %arg2[%c0, %c0_1, %c0_2] : memref<8x8x128xf32, #tpu.memory_space<vmem>>, vector<8x8x128xf32>
    %4 = vector.shape_cast %3 : vector<8x8x128xf32> to vector<64x128xf32>
    %c0_3 = arith.constant 0 : index
    %c0_4 = arith.constant 0 : index
    %5 = vector.load %arg4[%c0_3, %c0_4] : memref<128x384xf32, #tpu.memory_space<vmem>>, vector<128x384xf32>
    %cst = arith.constant dense<0.000000e+00> : vector<64x384xf32>
    %6 = tpu.matmul %4, %5, %cst {dimension_numbers = #tpu.dot_dimension_numbers<[1], [0], [0], [1], [0, 0, 1, 1], [], []>} : vector<64x128xf32>, vector<128x384xf32>, vector<64x384xf32> -> vector<64x384xf32>
    %c0_5 = arith.constant 0 : index
    %c0_6 = arith.constant 0 : index
    %7 = vector.load %arg5[%c0_5, %c0_6] : memref<1x384xf32, #tpu.memory_space<vmem>>, vector<1x384xf32>
    %8 = vector.broadcast %7 : vector<1x384xf32> to vector<64x384xf32>
    %9 = arith.addf %6, %8 : vector<64x384xf32>
    %10 = vector.shape_cast %9 : vector<64x384xf32> to vector<8x8x384xf32>
    %c0_7 = arith.constant 0 : index
    %c0_8 = arith.constant 0 : index
    %c0_9 = arith.constant 0 : index
    %11 = vector.load %arg12[%c0_7, %c0_8, %c0_9] : memref<8x8x384xf32, #tpu.memory_space<vmem>>, vector<8x8x384xf32>
    tpu.vector_store %arg12[%c0_7, %c0_8, %c0_9], %10 {strides = array<i32>} : memref<8x8x384xf32, #tpu.memory_space<vmem>>, vector<8x8x384xf32>,
    %c0_10 = arith.constant 0 : index
    %c0_11 = arith.constant 0 : index
    %c0_12 = arith.constant 0 : index
    %12 = vector.load %arg6[%c0_10, %c0_11, %c0_12] : memref<3x128x384xf32, #tpu.memory_space<vmem>>, vector<1x128x384xf32>
    %13 = vector.shape_cast %12 : vector<1x128x384xf32> to vector<128x384xf32>
    %c1 = arith.constant 1 : index
    %c0_13 = arith.constant 0 : index
    %c0_14 = arith.constant 0 : index
    %14 = vector.load %arg6[%c1, %c0_13, %c0_14] : memref<3x128x384xf32, #tpu.memory_space<vmem>>, vector<1x128x384xf32>
    %15 = vector.shape_cast %14 : vector<1x128x384xf32> to vector<128x384xf32>
    %c2 = arith.constant 2 : index
    %c0_15 = arith.constant 0 : index
    %c0_16 = arith.constant 0 : index
    %16 = vector.load %arg6[%c2, %c0_15, %c0_16] : memref<3x128x384xf32, #tpu.memory_space<vmem>>, vector<1x128x384xf32>
    %17 = vector.shape_cast %16 : vector<1x128x384xf32> to vector<128x384xf32>
    %c1_17 = arith.constant 1 : index
    %c0_18 = arith.constant 0 : index
    %c0_19 = arith.constant 0 : index
    %18 = vector.load %arg7[%c1_17, %c0_18, %c0_19] : memref<3x1x384xf32, #tpu.memory_space<vmem>>, vector<1x1x384xf32>
    %19 = vector.shape_cast %18 : vector<1x1x384xf32> to vector<1x384xf32>
    %20 = vector.shape_cast %19 : vector<1x384xf32> to vector<1x384xf32>
    %21 = vector.broadcast %20 : vector<1x384xf32> to vector<8x384xf32>
    %c2_20 = arith.constant 2 : index
    %c0_21 = arith.constant 0 : index
    %c0_22 = arith.constant 0 : index
    %22 = vector.load %arg7[%c2_20, %c0_21, %c0_22] : memref<3x1x384xf32, #tpu.memory_space<vmem>>, vector<1x1x384xf32>
    %23 = vector.shape_cast %22 : vector<1x1x384xf32> to vector<1x384xf32>
    %24 = vector.shape_cast %23 : vector<1x384xf32> to vector<1x384xf32>
    %25 = vector.broadcast %24 : vector<1x384xf32> to vector<8x384xf32>
    %c0_23 = arith.constant 0 : index
    %c0_24 = arith.constant 0 : index
    %26 = vector.load %arg11[%c0_23, %c0_24] : memref<8x128xf32, #tpu.memory_space<vmem>>, vector<8x128xf32>
    %c0_i32_25 = arith.constant 0 : i32
    %c8_i32 = arith.constant 8 : i32
    %27 = arith.addi %c0_i32_25, %c8_i32 : i32
    %c1_i32 = arith.constant 1 : i32
    %28 = scf.for %arg13 = %c0_i32_25 to %27 step %c1_i32 iter_args(%arg14 = %26) -> (vector<8x128xf32>)  : i32 {
      %39 = arith.index_cast %arg13 : i32 to index
      %c0_42 = arith.constant 0 : index
      %c0_43 = arith.constant 0 : index
      %40 = vector.load %arg12[%39, %c0_42, %c0_43] : memref<8x8x384xf32, #tpu.memory_space<vmem>>, vector<1x8x384xf32>
      %41 = vector.shape_cast %40 : vector<1x8x384xf32> to vector<8x384xf32>
      %cst_44 = arith.constant dense<0.000000e+00> : vector<8x384xf32>
      %42 = tpu.matmul %arg14, %13, %cst_44 {dimension_numbers = #tpu.dot_dimension_numbers<[1], [0], [0], [1], [0, 0, 1, 1], [], []>} : vector<8x128xf32>, vector<128x384xf32>, vector<8x384xf32> -> vector<8x384xf32>
      %43 = arith.addf %42, %41 : vector<8x384xf32>
      %44 = vector.extract_strided_slice %43 {offsets = [0, 0], sizes = [8, 128], strides = [1, 1]} : vector<8x384xf32> to vector<8x128xf32>
      %45 = vector.extract_strided_slice %43 {offsets = [0, 128], sizes = [8, 128], strides = [1, 1]} : vector<8x384xf32> to vector<8x128xf32>
      %46 = vector.extract_strided_slice %43 {offsets = [0, 256], sizes = [8, 128], strides = [1, 1]} : vector<8x384xf32> to vector<8x128xf32>
      %47 = arith.mulf %44, %45 : vector<8x128xf32>
      %48 = arith.mulf %arg14, %46 : vector<8x128xf32>
      %49 = arith.addf %47, %48 : vector<8x128xf32>
      %50 = vector.shape_cast %49 : vector<8x128xf32> to vector<1x8x128xf32>
      %c0_45 = arith.constant 0 : index
      %51 = arith.index_cast %arg13 : i32 to index
      %c0_46 = arith.constant 0 : index
      %c0_47 = arith.constant 0 : index
      %52 = vector.load %arg10[%c0_45, %51, %c0_46, %c0_47] : memref<3x8x8x128xf32, #tpu.memory_space<vmem>>, vector<1x1x8x128xf32>
      %53 = vector.shape_cast %52 : vector<1x1x8x128xf32> to vector<1x8x128xf32>
      %54 = vector.shape_cast %50 : vector<1x8x128xf32> to vector<1x1x8x128xf32>
      tpu.vector_store %arg10[%c0_45, %51, %c0_46, %c0_47], %54 {strides = array<i32>} : memref<3x8x8x128xf32, #tpu.memory_space<vmem>>, vector<1x1x8x128xf32>,
      %cst_48 = arith.constant dense<0.000000e+00> : vector<8x384xf32>
      %55 = tpu.matmul %49, %15, %cst_48 {dimension_numbers = #tpu.dot_dimension_numbers<[1], [0], [0], [1], [0, 0, 1, 1], [], []>} : vector<8x128xf32>, vector<128x384xf32>, vector<8x384xf32> -> vector<8x384xf32>
      %56 = arith.addf %55, %21 : vector<8x384xf32>
      %57 = vector.extract_strided_slice %56 {offsets = [0, 0], sizes = [8, 128], strides = [1, 1]} : vector<8x384xf32> to vector<8x128xf32>
      %58 = vector.extract_strided_slice %56 {offsets = [0, 128], sizes = [8, 128], strides = [1, 1]} : vector<8x384xf32> to vector<8x128xf32>
      %59 = vector.extract_strided_slice %56 {offsets = [0, 256], sizes = [8, 128], strides = [1, 1]} : vector<8x384xf32> to vector<8x128xf32>
      %60 = arith.mulf %57, %58 : vector<8x128xf32>
      %61 = arith.mulf %49, %59 : vector<8x128xf32>
      %62 = arith.addf %60, %61 : vector<8x128xf32>
      %63 = vector.shape_cast %62 : vector<8x128xf32> to vector<1x8x128xf32>
      %c1_49 = arith.constant 1 : index
      %64 = arith.index_cast %arg13 : i32 to index
      %c0_50 = arith.constant 0 : index
      %c0_51 = arith.constant 0 : index
      %65 = vector.load %arg10[%c1_49, %64, %c0_50, %c0_51] : memref<3x8x8x128xf32, #tpu.memory_space<vmem>>, vector<1x1x8x128xf32>
      %66 = vector.shape_cast %65 : vector<1x1x8x128xf32> to vector<1x8x128xf32>
      %67 = vector.shape_cast %63 : vector<1x8x128xf32> to vector<1x1x8x128xf32>
      tpu.vector_store %arg10[%c1_49, %64, %c0_50, %c0_51], %67 {strides = array<i32>} : memref<3x8x8x128xf32, #tpu.memory_space<vmem>>, vector<1x1x8x128xf32>,
      %cst_52 = arith.constant dense<0.000000e+00> : vector<8x384xf32>
      %68 = tpu.matmul %62, %17, %cst_52 {dimension_numbers = #tpu.dot_dimension_numbers<[1], [0], [0], [1], [0, 0, 1, 1], [], []>} : vector<8x128xf32>, vector<128x384xf32>, vector<8x384xf32> -> vector<8x384xf32>
      %69 = arith.addf %68, %25 : vector<8x384xf32>
      %70 = vector.extract_strided_slice %69 {offsets = [0, 0], sizes = [8, 128], strides = [1, 1]} : vector<8x384xf32> to vector<8x128xf32>
      %71 = vector.extract_strided_slice %69 {offsets = [0, 128], sizes = [8, 128], strides = [1, 1]} : vector<8x384xf32> to vector<8x128xf32>
      %72 = vector.extract_strided_slice %69 {offsets = [0, 256], sizes = [8, 128], strides = [1, 1]} : vector<8x384xf32> to vector<8x128xf32>
      %73 = arith.mulf %70, %71 : vector<8x128xf32>
      %74 = arith.mulf %62, %72 : vector<8x128xf32>
      %75 = arith.addf %73, %74 : vector<8x128xf32>
      %76 = vector.shape_cast %75 : vector<8x128xf32> to vector<1x8x128xf32>
      %c2_53 = arith.constant 2 : index
      %77 = arith.index_cast %arg13 : i32 to index
      %c0_54 = arith.constant 0 : index
      %c0_55 = arith.constant 0 : index
      %78 = vector.load %arg10[%c2_53, %77, %c0_54, %c0_55] : memref<3x8x8x128xf32, #tpu.memory_space<vmem>>, vector<1x1x8x128xf32>
      %79 = vector.shape_cast %78 : vector<1x1x8x128xf32> to vector<1x8x128xf32>
      %80 = vector.shape_cast %76 : vector<1x8x128xf32> to vector<1x1x8x128xf32>
      tpu.vector_store %arg10[%c2_53, %77, %c0_54, %c0_55], %80 {strides = array<i32>} : memref<3x8x8x128xf32, #tpu.memory_space<vmem>>, vector<1x1x8x128xf32>,
      scf.yield %75 : vector<8x128xf32>
    }
    %c8_i32_26 = arith.constant 8 : i32
    %c0_27 = arith.constant 0 : index
    %c0_28 = arith.constant 0 : index
    %29 = vector.load %arg11[%c0_27, %c0_28] : memref<8x128xf32, #tpu.memory_space<vmem>>, vector<8x128xf32>
    tpu.vector_store %arg11[%c0_27, %c0_28], %28 {strides = array<i32>} : memref<8x128xf32, #tpu.memory_space<vmem>>, vector<8x128xf32>,
    %c0_29 = arith.constant 0 : index
    %c0_30 = arith.constant 0 : index
    %c0_31 = arith.constant 0 : index
    %c0_32 = arith.constant 0 : index
    %30 = vector.load %arg10[%c0_29, %c0_30, %c0_31, %c0_32] : memref<3x8x8x128xf32, #tpu.memory_space<vmem>>, vector<3x8x8x128xf32>
    %31 = vector.shape_cast %30 : vector<3x8x8x128xf32> to vector<192x128xf32>
    %c0_33 = arith.constant 0 : index
    %c0_34 = arith.constant 0 : index
    %32 = vector.load %arg8[%c0_33, %c0_34] : memref<128x128xf32, #tpu.memory_space<vmem>>, vector<128x128xf32>
    %cst_35 = arith.constant dense<0.000000e+00> : vector<192x128xf32>
    %33 = tpu.matmul %31, %32, %cst_35 {dimension_numbers = #tpu.dot_dimension_numbers<[1], [0], [0], [1], [0, 0, 1, 1], [], []>} : vector<192x128xf32>, vector<128x128xf32>, vector<192x128xf32> -> vector<192x128xf32>
    %c0_36 = arith.constant 0 : index
    %c0_37 = arith.constant 0 : index
    %34 = vector.load %arg9[%c0_36, %c0_37] : memref<1x128xf32, #tpu.memory_space<vmem>>, vector<1x128xf32>
    %35 = vector.broadcast %34 : vector<1x128xf32> to vector<192x128xf32>
    %36 = arith.addf %33, %35 : vector<192x128xf32>
    %37 = vector.shape_cast %36 : vector<192x128xf32> to vector<3x8x8x128xf32>
    %c0_38 = arith.constant 0 : index
    %c0_39 = arith.constant 0 : index
    %c0_40 = arith.constant 0 : index
    %c0_41 = arith.constant 0 : index
    %38 = vector.load %arg10[%c0_38, %c0_39, %c0_40, %c0_41] : memref<3x8x8x128xf32, #tpu.memory_space<vmem>>, vector<3x8x8x128xf32>
    tpu.vector_store %arg10[%c0_38, %c0_39, %c0_40, %c0_41], %37 {strides = array<i32>} : memref<3x8x8x128xf32, #tpu.memory_space<vmem>>, vector<3x8x8x128xf32>,
    return
  }
  func.func @transform_0(%arg0: i32, %arg1: i32) -> (i32, i32, i32) {
    %c0_i32 = arith.constant 0 : i32
    %c0_i32_0 = arith.constant 0 : i32
    return %arg1, %arg0, %c0_i32 : i32, i32, i32
  }
  func.func @transform_1(%arg0: i32, %arg1: i32) -> (i32, i32) {
    %c0_i32 = arith.constant 0 : i32
    %c0_i32_0 = arith.constant 0 : i32
    return %arg0, %c0_i32 : i32, i32
  }
  func.func @transform_2(%arg0: i32, %arg1: i32) -> (i32, i32) {
    %c0_i32 = arith.constant 0 : i32
    %c0_i32_0 = arith.constant 0 : i32
    %c0_i32_1 = arith.constant 0 : i32
    return %c0_i32, %c0_i32_0 : i32, i32
  }
  func.func @transform_3(%arg0: i32, %arg1: i32) -> (i32, i32) {
    %c0_i32 = arith.constant 0 : i32
    %c0_i32_0 = arith.constant 0 : i32
    %c0_i32_1 = arith.constant 0 : i32
    return %c0_i32, %c0_i32_0 : i32, i32
  }
  func.func @transform_4(%arg0: i32, %arg1: i32) -> (i32, i32, i32) {
    %c0_i32 = arith.constant 0 : i32
    %c0_i32_0 = arith.constant 0 : i32
    %c0_i32_1 = arith.constant 0 : i32
    %c0_i32_2 = arith.constant 0 : i32
    return %c0_i32, %c0_i32_0, %c0_i32_1 : i32, i32, i32
  }
  func.func @transform_5(%arg0: i32, %arg1: i32) -> (i32, i32, i32) {
    %c0_i32 = arith.constant 0 : i32
    %c0_i32_0 = arith.constant 0 : i32
    %c0_i32_1 = arith.constant 0 : i32
    %c0_i32_2 = arith.constant 0 : i32
    return %c0_i32, %c0_i32_0, %c0_i32_1 : i32, i32, i32
  }
  func.func @transform_6(%arg0: i32, %arg1: i32) -> (i32, i32) {
    %c0_i32 = arith.constant 0 : i32
    %c0_i32_0 = arith.constant 0 : i32
    %c0_i32_1 = arith.constant 0 : i32
    return %c0_i32, %c0_i32_0 : i32, i32
  }
  func.func @transform_7(%arg0: i32, %arg1: i32) -> (i32, i32) {
    %c0_i32 = arith.constant 0 : i32
    %c0_i32_0 = arith.constant 0 : i32
    %c0_i32_1 = arith.constant 0 : i32
    return %c0_i32, %c0_i32_0 : i32, i32
  }
  func.func @transform_8(%arg0: i32, %arg1: i32) -> (i32, i32, i32, i32) {
    %c0_i32 = arith.constant 0 : i32
    %c0_i32_0 = arith.constant 0 : i32
    %c0_i32_1 = arith.constant 0 : i32
    return %c0_i32, %arg1, %arg0, %c0_i32_0 : i32, i32, i32, i32
  }
}

</mosaic_0001>

<bundles_post_ra>
// kernel: tpu_custom_call.1
= control target key start
LH: loop header
LB: loop body
LE: loop exit
PB: predicated region body
PF: predicated region fallthrough
CT: control target
= control target key end

     0   :  { %13 = vsyncpa [#allocation5], 0  ;;  %s2910_s0 = inlined_call_operand.hbm [shape: f32[8,8,128], index: 0, kind: input, shape index: {}]   ;;  %s2911_s1 = inlined_call_operand.hbm [shape: f32[8,128], index: 1, kind: input, shape index: {}]   ;;  %s2912_s2 = inlined_call_operand.hbm [shape: f32[128,384], index: 2, kind: input, shape index: {}]   ;;  %s2913_s3 = inlined_call_operand.vmem [shape: f32[1,384], index: 3, kind: input, shape index: {}]   ;;  %s2914_s4 = inlined_call_operand.hbm [shape: f32[3,128,384], index: 4, kind: input, shape index: {}]   ;;  %s2915_s5 = inlined_call_operand.vmem [shape: f32[3,1,384], index: 5, kind: input, shape index: {}]   ;;  %s2916_s6 = inlined_call_operand.hbm [shape: f32[128,128], index: 6, kind: input, shape index: {}]   ;;  %s2917_s7 = inlined_call_operand.vmem [shape: f32[1,128], index: 7, kind: input, shape index: {}]   ;;  %s2918_s8 = inlined_call_operand.hbm [shape: f32[3,8,8,128], index: 8, kind: output, shape index: {}]  }
   0x1   :  { %14 = vsyncpa [#allocation8], 0 }
   0x2   :  { %15 = vsyncpa [#allocation11], 0 }
   0x3   :  { %16 = vsyncpa [#allocation6], 0  ;;  %s2156_s27 = smov [#allocation7]   ;;  %s2000_s9 = scalar_lea.hbm %s2911_s1, 128 }
   0x4   :  { %s35_s28 = sshll.u32 %s2156_s27, 4  ;;  %p2001_p0 = scmp.ne.s32.totalorder %s2911_s1, %s2000_s9  ;;  %s36_s28 = int_to_ptr.vmem [resolvable:$true] %s35_s28 }
   0x5   :  { %p2004_p1 = scmp.lt.u32.totalorder %s2000_s9, %s2911_s1 }
   0x7   :  { %p2006_p2 = pnand %p2004_p1, %p2001_p0 }
   0x9   :  { %2009 = shalt.err (!%p2006_p2)
}
   0xa   :  { %s2010_s14 = scalar_lea.vmem %s36_s28, 128  ;;  %p2015_p4 = scmp.lt.s32.totalorder %s36_s28, %s36_s28 }
   0xb   :  { %p2011_p3 = scmp.ne.s32.totalorder %s36_s28, %s2010_s14  ;;  %p2016_p5 = scmp.lt.s32.totalorder %s2010_s14, %s2010_s14 }
   0xd   :  { %p2017_p6 = por %p2016_p5, %p2015_p4 }
   0xf   :  { %p2018_p7 = pnand %p2017_p6, %p2011_p3 }
  0x11   :  { %2021 = shalt.err (!%p2018_p7)
}
  0x12   :  { %38 = dma.hbm_to_vmem [thread:$0]  %s2911_s1, 128, %s36_s28, [#allocation8]  }
  0x13   :  { %s2157_s17 = smov [#allocation10]   ;;  %s2158_s19 = smov [#allocation4]  }
  0x14   :  { %s58_s18 = sshll.u32 %s2157_s17, 4  ;;  %s22_s20 = sshll.u32 %s2158_s19, 4  ;;  %s59_s18 = int_to_ptr.vmem [resolvable:$true] %s58_s18  ;;  %s23_s20 = int_to_ptr.vmem [resolvable:$true] %s22_s20 }
  0x15   :  { %s2022_s23 = scalar_lea.hbm %s2914_s4, 18432 }
  0x16   :  { %p2023_p8 = scmp.ne.s32.totalorder %s2914_s4, %s2022_s23  ;;  %p2026_p9 = scmp.lt.u32.totalorder %s2022_s23, %s2914_s4 }
  0x18   :  { %p2028_p10 = pnand %p2026_p9, %p2023_p8 }
  0x1a   :  { %2031 = shalt.err (!%p2028_p10)
}
  0x1b   :  { %s2032_s1 = scalar_lea.vmem %s59_s18, 18432  ;;  %p2037_p12 = scmp.lt.s32.totalorder %s59_s18, %s59_s18 }
  0x1c   :  { %p2033_p11 = scmp.ne.s32.totalorder %s59_s18, %s2032_s1  ;;  %p2038_p13 = scmp.lt.s32.totalorder %s2032_s1, %s2032_s1 }
  0x1e   :  { %p2039_p0 = por %p2038_p13, %p2037_p12 }
  0x20   :  { %p2040_p1 = pnand %p2039_p0, %p2033_p11 }
  0x22   :  { %2043 = shalt.err (!%p2040_p1)
}
  0x23   :  { %s2159_s28 = smov 384   ;;  %s2160_s29 = smov 24  }
  0x24   :  { %64 = dma.hbm_to_vmem [thread:$0]  %s2914_s4, 18432, %s59_s18, [#allocation11], %s2159_s28, %s2159_s28, %s2160_s29  }
  0x25   :  { %s2044_s12 = scalar_lea.hbm %s2910_s0, 1024 }
  0x26   :  { %p2045_p2 = scmp.ne.s32.totalorder %s2910_s0, %s2044_s12  ;;  %p2048_p3 = scmp.lt.u32.totalorder %s2044_s12, %s2910_s0 }
  0x28   :  { %p2050_p4 = pnand %p2048_p3, %p2045_p2 }
  0x2a   :  { %2053 = shalt.err (!%p2050_p4)
}
  0x2b   :  { %s2054_s17 = scalar_lea.vmem %s23_s20, 1024  ;;  %p2059_p6 = scmp.lt.s32.totalorder %s23_s20, %s23_s20 }
  0x2c   :  { %p2055_p5 = scmp.ne.s32.totalorder %s23_s20, %s2054_s17  ;;  %p2060_p7 = scmp.lt.s32.totalorder %s2054_s17, %s2054_s17 }
  0x2e   :  { %p2061_p8 = por %p2060_p7, %p2059_p6 }
  0x30   :  { %p2062_p9 = pnand %p2061_p8, %p2055_p5 }
  0x32   :  { %2065 = shalt.err (!%p2062_p9)
}
  0x33   :  { %s2161_s4 = smov 128   ;;  %s2162_s18 = smov 8  }
  0x34   :  { %28 = dma.hbm_to_vmem [thread:$0]  %s2910_s0, 1024, %s23_s20, [#allocation5], %s2161_s4, %s2161_s4, %s2162_s18  }
  0x35   :  { %s2163_s22 = smov [#allocation9]   ;;  %s2164_s24 = smov [#allocation12]  }
  0x36   :  { %s44_s23 = sshll.u32 %s2163_s22, 4  ;;  %s72_s25 = sshll.u32 %s2164_s24, 4  ;;  %s45_s23 = int_to_ptr.vmem [resolvable:$true] %s44_s23  ;;  %s73_s25 = int_to_ptr.vmem [resolvable:$true] %s72_s25 }
  0x37   :  { %s2066_s1 = scalar_lea.hbm %s2912_s2, 6144 }
  0x38   :  { %p2067_p10 = scmp.ne.s32.totalorder %s2912_s2, %s2066_s1  ;;  %p2070_p11 = scmp.lt.u32.totalorder %s2066_s1, %s2912_s2 }
  0x3a   :  { %p2072_p12 = pnand %p2070_p11, %p2067_p10 }
  0x3c   :  { %2075 = shalt.err (!%p2072_p12)
}
  0x3d   :  { %s2076_s0 = scalar_lea.vmem %s45_s23, 6144  ;;  %p2081_p0 = scmp.lt.s32.totalorder %s45_s23, %s45_s23 }
  0x3e   :  { %p2077_p13 = scmp.ne.s32.totalorder %s45_s23, %s2076_s0  ;;  %p2082_p1 = scmp.lt.s32.totalorder %s2076_s0, %s2076_s0 }
  0x40   :  { %p2083_p2 = por %p2082_p1, %p2081_p0 }
  0x42   :  { %p2084_p3 = pnand %p2083_p2, %p2077_p13 }
  0x44   :  { %2087 = shalt.err (!%p2084_p3)
}
  0x45   :  { %50 = dma.hbm_to_vmem [thread:$0]  %s2912_s2, 6144, %s45_s23, [#allocation8], %s2159_s28, %s2159_s28, %s2160_s29  }
  0x46   :  { %s2088_s15 = scalar_lea.hbm %s2916_s6, 2048 }
  0x47   :  { %p2089_p4 = scmp.ne.s32.totalorder %s2916_s6, %s2088_s15  ;;  %p2092_p5 = scmp.lt.u32.totalorder %s2088_s15, %s2916_s6 }
  0x49   :  { %p2094_p6 = pnand %p2092_p5, %p2089_p4 }
  0x4b   :  { %2097 = shalt.err (!%p2094_p6)
}
  0x4c   :  { %s2098_s22 = scalar_lea.vmem %s73_s25, 2048  ;;  %p2103_p8 = scmp.lt.s32.totalorder %s73_s25, %s73_s25 }
  0x4d   :  { %p2099_p7 = scmp.ne.s32.totalorder %s73_s25, %s2098_s22  ;;  %p2104_p9 = scmp.lt.s32.totalorder %s2098_s22, %s2098_s22 }
  0x4f   :  { %p2105_p10 = por %p2104_p9, %p2103_p8 }
  0x51   :  { %p2106_p11 = pnand %p2105_p10, %p2099_p7 }
  0x53   :  { %2109 = shalt.err (!%p2106_p11)
}
  0x54   :  { %78 = dma.hbm_to_vmem [thread:$0]  %s2916_s6, 2048, %s73_s25, [#allocation11], %s2161_s4, %s2161_s4, %s2162_s18  }
  0x55   :  { %2140 = dma.done.wait [#allocation5], 1024  }
  0x56   :  { %2141 = vsyncadd [#allocation5], 4294966272 }
  0x57   :  { %2142 = dma.done.wait [#allocation8], 6272  }
  0x58   :  { %2143 = vsyncadd [#allocation8], 4294961024 }
  0x59   :  { %2144 = dma.done.wait [#allocation11], 20480  }
  0x5a   :  { %2145 = vsyncadd [#allocation11], 4294946816  ;;  %v2919_v0 = vmov 0.0   ;;  %v2288_v1 = vld [vmem:[#allocation7] sm:$0xff]   ;;  %v2290_v2 = vld [vmem:[#allocation10] sm:$0xff] }
  0x5b   :  { %239 = vmatprep.mubr.f32.mxu0 %v2919_v0  ;;  %2925 = vst [vmem:[#allocation18_spill] sm:$0xff] %v2290_v2  ;;  %v2292_v3 = vld [vmem:[#allocation10 + $0x8] sm:$0xff]  ;;  %v2294_v4 = vld [vmem:[#allocation10 + $0x10] sm:$0xff]  ;;  %v2296_v5 = vld [vmem:[#allocation10 + $0x18] sm:$0xff] }
  0x5c   :  { %2926 = vst [vmem:[#allocation19_spill] sm:$0xff] %v2292_v3  ;;  %2927 = vst [vmem:[#allocation20_spill] sm:$0xff] %v2294_v4  ;;  %v2298_v6 = vld [vmem:[#allocation10 + $0x20] sm:$0xff]  ;;  %v2300_v7 = vld [vmem:[#allocation10 + $0x28] sm:$0xff] }
  0x5d   :  { %v2302_v8 = vld [vmem:[#allocation10 + $0x30] sm:$0xff]  ;;  %v2304_v9 = vld [vmem:[#allocation10 + $0x38] sm:$0xff]  ;;  %v2306_v10 = vld [vmem:[#allocation10 + $0x40] sm:$0xff] }
  0x5e   :  { %v2308_v11 = vld [vmem:[#allocation10 + $0x48] sm:$0xff]  ;;  %v2310_v12 = vld [vmem:[#allocation10 + $0x50] sm:$0xff]  ;;  %v2312_v13 = vld [vmem:[#allocation10 + $0x58] sm:$0xff] }
  0x5f   :  { %v2314_v14 = vld [vmem:[#allocation10 + $0x60] sm:$0xff]  ;;  %v2316_v15 = vld [vmem:[#allocation10 + $0x68] sm:$0xff]  ;;  %v2318_v16 = vld [vmem:[#allocation10 + $0x70] sm:$0xff] }
  0x60   :  { %v2320_v17 = vld [vmem:[#allocation10 + $0x78] sm:$0xff]  ;;  %v2322_v18 = vld [vmem:[#allocation10 + $0x80] sm:$0xff]  ;;  %v2324_v19 = vld [vmem:[#allocation10 + $0x88] sm:$0xff] }
  0x61   :  { %v2326_v20 = vld [vmem:[#allocation10 + $0x90] sm:$0xff]  ;;  %v2328_v21 = vld [vmem:[#allocation10 + $0x98] sm:$0xff]  ;;  %v2330_v22 = vld [vmem:[#allocation10 + $0xa0] sm:$0xff] }
  0x62   :  { %v2332_v23 = vld [vmem:[#allocation10 + $0xa8] sm:$0xff]  ;;  %v2334_v24 = vld [vmem:[#allocation10 + $0xb0] sm:$0xff]  ;;  %v2336_v25 = vld [vmem:[#allocation10 + $0xb8] sm:$0xff] }
  0x63   :  { %v2338_v26 = vld [vmem:[#allocation10 + $0xc0] sm:$0xff]  ;;  %v2340_v27 = vld [vmem:[#allocation10 + $0xc8] sm:$0xff]  ;;  %v2342_v28 = vld [vmem:[#allocation10 + $0xd0] sm:$0xff] }
  0x64   :  { %v2344_v29 = vld [vmem:[#allocation10 + $0xd8] sm:$0xff]  ;;  %v2346_v30 = vld [vmem:[#allocation10 + $0xe0] sm:$0xff]  ;;  %v2348_v31 = vld [vmem:[#allocation10 + $0xe8] sm:$0xff] }
  0x65   :  { %v2350_v32 = vld [vmem:[#allocation10 + $0xf0] sm:$0xff]  ;;  %v2352_v33 = vld [vmem:[#allocation10 + $0xf8] sm:$0xff]  ;;  %v2354_v34 = vld [vmem:[#allocation10 + $0x100] sm:$0xff] }
  0x66   :  { %v2356_v35 = vld [vmem:[#allocation10 + $0x108] sm:$0xff]  ;;  %v2358_v36 = vld [vmem:[#allocation10 + $0x110] sm:$0xff]  ;;  %v2360_v37 = vld [vmem:[#allocation10 + $0x118] sm:$0xff] }
  0x67   :  { %v2362_v38 = vld [vmem:[#allocation10 + $0x120] sm:$0xff]  ;;  %v2364_v39 = vld [vmem:[#allocation10 + $0x128] sm:$0xff]  ;;  %v2366_v40 = vld [vmem:[#allocation10 + $0x130] sm:$0xff] }
  0x68   :  { %2928 = vst [vmem:[#allocation21_spill] sm:$0xff] %v2362_v38  ;;  %v2368_v41 = vld [vmem:[#allocation10 + $0x138] sm:$0xff]  ;;  %v2370_v42 = vld [vmem:[#allocation10 + $0x140] sm:$0xff]  ;;  %v2372_v43 = vld [vmem:[#allocation10 + $0x148] sm:$0xff] }
  0x69   :  { %2929 = vst [vmem:[#allocation22_spill] sm:$0xff] %v2368_v41  ;;  %2930 = vst [vmem:[#allocation23_spill] sm:$0xff] %v2372_v43  ;;  %v2374_v44 = vld [vmem:[#allocation10 + $0x150] sm:$0xff]  ;;  %v2376_v45 = vld [vmem:[#allocation10 + $0x158] sm:$0xff] }
  0x6a   :  { %2931 = vst [vmem:[#allocation24_spill] sm:$0xff] %v2374_v44  ;;  %2932 = vst [vmem:[#allocation25_spill] sm:$0xff] %v2376_v45  ;;  %v2378_v46 = vld [vmem:[#allocation10 + $0x160] sm:$0xff]  ;;  %v2380_v47 = vld [vmem:[#allocation10 + $0x168] sm:$0xff] }
  0x6b   :  { %2933 = vst [vmem:[#allocation26_spill] sm:$0xff] %v2378_v46  ;;  %2934 = vst [vmem:[#allocation27_spill] sm:$0xff] %v2380_v47  ;;  %v2382_v48 = vld [vmem:[#allocation10 + $0x170] sm:$0xff]  ;;  %v2384_v49 = vld [vmem:[#allocation10 + $0x178] sm:$0xff] }
  0x6c   :  { %2935 = vst [vmem:[#allocation28_spill] sm:$0xff] %v2382_v48  ;;  %2936 = vst [vmem:[#allocation29_spill] sm:$0xff] %v2384_v49  ;;  %v2386_v50 = vld [vmem:[#allocation10 + $0x180] sm:$0xff]  ;;  %v2388_v51 = vld [vmem:[#allocation10 + $0x188] sm:$0xff] }
  0x6d   :  { %2937 = vst [vmem:[#allocation30_spill] sm:$0xff] %v2386_v50  ;;  %2938 = vst [vmem:[#allocation31_spill] sm:$0xff] %v2388_v51  ;;  %v2390_v52 = vld [vmem:[#allocation10 + $0x190] sm:$0xff]  ;;  %v2392_v53 = vld [vmem:[#allocation10 + $0x198] sm:$0xff] }
  0x6e   :  { %2939 = vst [vmem:[#allocation32_spill] sm:$0xff] %v2390_v52  ;;  %2940 = vst [vmem:[#allocation33_spill] sm:$0xff] %v2392_v53  ;;  %v2394_v54 = vld [vmem:[#allocation10 + $0x1a0] sm:$0xff]  ;;  %v2396_v55 = vld [vmem:[#allocation10 + $0x1a8] sm:$0xff] }
  0x6f   :  { %2941 = vst [vmem:[#allocation34_spill] sm:$0xff] %v2394_v54  ;;  %2942 = vst [vmem:[#allocation35_spill] sm:$0xff] %v2396_v55  ;;  %v2398_v56 = vld [vmem:[#allocation10 + $0x1b0] sm:$0xff]  ;;  %v2400_v57 = vld [vmem:[#allocation10 + $0x1b8] sm:$0xff] }
  0x70   :  { %2943 = vst [vmem:[#allocation36_spill] sm:$0xff] %v2398_v56  ;;  %2944 = vst [vmem:[#allocation37_spill] sm:$0xff] %v2400_v57  ;;  %v2402_v58 = vld [vmem:[#allocation10 + $0x1c0] sm:$0xff]  ;;  %v2404_v59 = vld [vmem:[#allocation10 + $0x1c8] sm:$0xff] }
  0x71   :  { %2945 = vst [vmem:[#allocation38_spill] sm:$0xff] %v2402_v58  ;;  %2946 = vst [vmem:[#allocation39_spill] sm:$0xff] %v2404_v59  ;;  %v2406_v60 = vld [vmem:[#allocation10 + $0x1d0] sm:$0xff]  ;;  %v2408_v61 = vld [vmem:[#allocation10 + $0x1d8] sm:$0xff] }
  0x72   :  { %2947 = vst [vmem:[#allocation40_spill] sm:$0xff] %v2406_v60  ;;  %2948 = vst [vmem:[#allocation41_spill] sm:$0xff] %v2408_v61  ;;  %v2410_v62 = vld [vmem:[#allocation10 + $0x1e0] sm:$0xff]  ;;  %v2412_v63 = vld [vmem:[#allocation10 + $0x1e8] sm:$0xff] }
  0x73   :  { %2949 = vst [vmem:[#allocation42_spill] sm:$0xff] %v2410_v62  ;;  %2950 = vst [vmem:[#allocation43_spill] sm:$0xff] %v2412_v63  ;;  %v2414_v0 = vld [vmem:[#allocation10 + $0x1f0] sm:$0xff]  ;;  %v2416_v53 = vld [vmem:[#allocation10 + $0x1f8] sm:$0xff] }
  0x74   :  { %2951 = vst [vmem:[#allocation44_spill] sm:$0xff] %v2414_v0  ;;  %2952 = vst [vmem:[#allocation45_spill] sm:$0xff] %v2416_v53  ;;  %v2418_v50 = vld [vmem:[#allocation10 + $0x200] sm:$0xff]  ;;  %v2420_v56 = vld [vmem:[#allocation10 + $0x208] sm:$0xff] }
  0x75   :  { %2953 = vst [vmem:[#allocation46_spill] sm:$0xff] %v2418_v50  ;;  %2954 = vst [vmem:[#allocation47_spill] sm:$0xff] %v2420_v56  ;;  %v2422_v57 = vld [vmem:[#allocation10 + $0x210] sm:$0xff]  ;;  %v2424_v58 = vld [vmem:[#allocation10 + $0x218] sm:$0xff] }
  0x76   :  { %2955 = vst [vmem:[#allocation48_spill] sm:$0xff] %v2422_v57  ;;  %2956 = vst [vmem:[#allocation49_spill] sm:$0xff] %v2424_v58  ;;  %v2426_v59 = vld [vmem:[#allocation10 + $0x220] sm:$0xff]  ;;  %v2428_v60 = vld [vmem:[#allocation10 + $0x228] sm:$0xff] }
  0x77   :  { %2957 = vst [vmem:[#allocation50_spill] sm:$0xff] %v2426_v59  ;;  %2958 = vst [vmem:[#allocation51_spill] sm:$0xff] %v2428_v60  ;;  %v2430_v61 = vld [vmem:[#allocation10 + $0x230] sm:$0xff]  ;;  %v2432_v62 = vld [vmem:[#allocation10 + $0x238] sm:$0xff] }
  0x78   :  { %2959 = vst [vmem:[#allocation52_spill] sm:$0xff] %v2430_v61  ;;  %2960 = vst [vmem:[#allocation53_spill] sm:$0xff] %v2432_v62  ;;  %v2434_v63 = vld [vmem:[#allocation10 + $0x240] sm:$0xff]  ;;  %v2436_v0 = vld [vmem:[#allocation10 + $0x248] sm:$0xff] }
  0x79   :  { %2961 = vst [vmem:[#allocation54_spill] sm:$0xff] %v2434_v63  ;;  %2962 = vst [vmem:[#allocation55_spill] sm:$0xff] %v2436_v0  ;;  %v2438_v53 = vld [vmem:[#allocation10 + $0x250] sm:$0xff]  ;;  %v2440_v50 = vld [vmem:[#allocation10 + $0x258] sm:$0xff] }
  0x7a   :  { %2963 = vst [vmem:[#allocation56_spill] sm:$0xff] %v2438_v53  ;;  %2964 = vst [vmem:[#allocation57_spill] sm:$0xff] %v2440_v50  ;;  %v2442_v56 = vld [vmem:[#allocation10 + $0x260] sm:$0xff]  ;;  %v2444_v57 = vld [vmem:[#allocation10 + $0x268] sm:$0xff] }
  0x7b   :  { %2965 = vst [vmem:[#allocation58_spill] sm:$0xff] %v2442_v56  ;;  %2966 = vst [vmem:[#allocation59_spill] sm:$0xff] %v2444_v57  ;;  %v2446_v58 = vld [vmem:[#allocation10 + $0x270] sm:$0xff]  ;;  %v2448_v59 = vld [vmem:[#allocation10 + $0x278] sm:$0xff] }
  0x7c   :  { %2967 = vst [vmem:[#allocation60_spill] sm:$0xff] %v2446_v58  ;;  %2968 = vst [vmem:[#allocation61_spill] sm:$0xff] %v2448_v59  ;;  %v2450_v60 = vld [vmem:[#allocation10 + $0x280] sm:$0xff]  ;;  %v2452_v61 = vld [vmem:[#allocation10 + $0x288] sm:$0xff] }
  0x7d   :  { %2969 = vst [vmem:[#allocation62_spill] sm:$0xff] %v2450_v60  ;;  %2970 = vst [vmem:[#allocation63_spill] sm:$0xff] %v2452_v61  ;;  %v2454_v62 = vld [vmem:[#allocation10 + $0x290] sm:$0xff]  ;;  %v2456_v63 = vld [vmem:[#allocation10 + $0x298] sm:$0xff] }
  0x7e   :  { %2971 = vst [vmem:[#allocation64_spill] sm:$0xff] %v2454_v62  ;;  %2972 = vst [vmem:[#allocation65_spill] sm:$0xff] %v2456_v63  ;;  %v2458_v0 = vld [vmem:[#allocation10 + $0x2a0] sm:$0xff]  ;;  %v2460_v53 = vld [vmem:[#allocation10 + $0x2a8] sm:$0xff] }
  0x7f   :  { %2973 = vst [vmem:[#allocation66_spill] sm:$0xff] %v2458_v0  ;;  %2974 = vst [vmem:[#allocation67_spill] sm:$0xff] %v2460_v53  ;;  %v2462_v50 = vld [vmem:[#allocation10 + $0x2b0] sm:$0xff]  ;;  %v2464_v56 = vld [vmem:[#allocation10 + $0x2b8] sm:$0xff] }
  0x80   :  { %2975 = vst [vmem:[#allocation68_spill] sm:$0xff] %v2462_v50  ;;  %2976 = vst [vmem:[#allocation69_spill] sm:$0xff] %v2464_v56  ;;  %v2466_v57 = vld [vmem:[#allocation10 + $0x2c0] sm:$0xff]  ;;  %v2468_v58 = vld [vmem:[#allocation10 + $0x2c8] sm:$0xff] }
  0x81   :  { %2977 = vst [vmem:[#allocation70_spill] sm:$0xff] %v2466_v57  ;;  %2978 = vst [vmem:[#allocation71_spill] sm:$0xff] %v2468_v58  ;;  %v2470_v59 = vld [vmem:[#allocation10 + $0x2d0] sm:$0xff]  ;;  %v2472_v60 = vld [vmem:[#allocation10 + $0x2d8] sm:$0xff] }
  0x82   :  { %2979 = vst [vmem:[#allocation72_spill] sm:$0xff] %v2470_v59  ;;  %2980 = vst [vmem:[#allocation73_spill] sm:$0xff] %v2472_v60  ;;  %v2474_v61 = vld [vmem:[#allocation10 + $0x2e0] sm:$0xff]  ;;  %v2476_v62 = vld [vmem:[#allocation10 + $0x2e8] sm:$0xff] }
  0x83   :  { %2981 = vst [vmem:[#allocation74_spill] sm:$0xff] %v2474_v61  ;;  %2982 = vst [vmem:[#allocation75_spill] sm:$0xff] %v2476_v62  ;;  %v2478_v63 = vld [vmem:[#allocation10 + $0x2f0] sm:$0xff]  ;;  %v2480_v0 = vld [vmem:[#allocation10 + $0x2f8] sm:$0xff] }
  0x84   :  { %2983 = vst [vmem:[#allocation76_spill] sm:$0xff] %v2478_v63  ;;  %2984 = vst [vmem:[#allocation77_spill] sm:$0xff] %v2480_v0  ;;  %v2482_v53 = vld [vmem:[#allocation10 + $0x300] sm:$0xff]  ;;  %v2484_v50 = vld [vmem:[#allocation10 + $0x308] sm:$0xff] }
  0x85   :  { %2985 = vst [vmem:[#allocation78_spill] sm:$0xff] %v2482_v53  ;;  %2986 = vst [vmem:[#allocation79_spill] sm:$0xff] %v2484_v50  ;;  %v2486_v56 = vld [vmem:[#allocation10 + $0x310] sm:$0xff]  ;;  %v2488_v57 = vld [vmem:[#allocation10 + $0x318] sm:$0xff] }
  0x86   :  { %2987 = vst [vmem:[#allocation80_spill] sm:$0xff] %v2486_v56  ;;  %2988 = vst [vmem:[#allocation81_spill] sm:$0xff] %v2488_v57  ;;  %v2490_v58 = vld [vmem:[#allocation10 + $0x320] sm:$0xff]  ;;  %v2492_v59 = vld [vmem:[#allocation10 + $0x328] sm:$0xff] }
  0x87   :  { %2989 = vst [vmem:[#allocation82_spill] sm:$0xff] %v2490_v58  ;;  %2990 = vst [vmem:[#allocation83_spill] sm:$0xff] %v2492_v59  ;;  %v2494_v60 = vld [vmem:[#allocation10 + $0x330] sm:$0xff]  ;;  %v2496_v61 = vld [vmem:[#allocation10 + $0x338] sm:$0xff] }
  0x88   :  { %2991 = vst [vmem:[#allocation84_spill] sm:$0xff] %v2494_v60  ;;  %2992 = vst [vmem:[#allocation85_spill] sm:$0xff] %v2496_v61  ;;  %v2498_v62 = vld [vmem:[#allocation10 + $0x340] sm:$0xff]  ;;  %v2500_v63 = vld [vmem:[#allocation10 + $0x348] sm:$0xff] }
  0x89   :  { %2993 = vst [vmem:[#allocation86_spill] sm:$0xff] %v2498_v62  ;;  %2994 = vst [vmem:[#allocation87_spill] sm:$0xff] %v2500_v63  ;;  %v2502_v0 = vld [vmem:[#allocation10 + $0x350] sm:$0xff]  ;;  %v2504_v53 = vld [vmem:[#allocation10 + $0x358] sm:$0xff] }
  0x8a   :  { %2995 = vst [vmem:[#allocation88_spill] sm:$0xff] %v2502_v0  ;;  %2996 = vst [vmem:[#allocation89_spill] sm:$0xff] %v2504_v53  ;;  %v2506_v50 = vld [vmem:[#allocation10 + $0x360] sm:$0xff]  ;;  %v2508_v56 = vld [vmem:[#allocation10 + $0x368] sm:$0xff] }
  0x8b   :  { %2997 = vst [vmem:[#allocation90_spill] sm:$0xff] %v2506_v50  ;;  %2998 = vst [vmem:[#allocation91_spill] sm:$0xff] %v2508_v56  ;;  %v2510_v57 = vld [vmem:[#allocation10 + $0x370] sm:$0xff]  ;;  %v2512_v58 = vld [vmem:[#allocation10 + $0x378] sm:$0xff] }
  0x8c   :  { %2999 = vst [vmem:[#allocation92_spill] sm:$0xff] %v2510_v57  ;;  %3000 = vst [vmem:[#allocation93_spill] sm:$0xff] %v2512_v58  ;;  %v2514_v59 = vld [vmem:[#allocation10 + $0x380] sm:$0xff]  ;;  %v2516_v60 = vld [vmem:[#allocation10 + $0x388] sm:$0xff] }
  0x8d   :  { %3001 = vst [vmem:[#allocation94_spill] sm:$0xff] %v2514_v59  ;;  %3002 = vst [vmem:[#allocation95_spill] sm:$0xff] %v2516_v60  ;;  %v2518_v61 = vld [vmem:[#allocation10 + $0x390] sm:$0xff]  ;;  %v2520_v62 = vld [vmem:[#allocation10 + $0x398] sm:$0xff] }
  0x8e   :  { %3003 = vst [vmem:[#allocation96_spill] sm:$0xff] %v2518_v61  ;;  %3004 = vst [vmem:[#allocation97_spill] sm:$0xff] %v2520_v62  ;;  %v2522_v63 = vld [vmem:[#allocation10 + $0x3a0] sm:$0xff]  ;;  %v2524_v0 = vld [vmem:[#allocation10 + $0x3a8] sm:$0xff] }
  0x8f   :  { %3005 = vst [vmem:[#allocation98_spill] sm:$0xff] %v2522_v63  ;;  %3006 = vst [vmem:[#allocation99_spill] sm:$0xff] %v2524_v0  ;;  %v2526_v53 = vld [vmem:[#allocation10 + $0x3b0] sm:$0xff]  ;;  %v2528_v50 = vld [vmem:[#allocation10 + $0x3b8] sm:$0xff] }
  0x90   :  { %3007 = vst [vmem:[#allocation100_spill] sm:$0xff] %v2526_v53  ;;  %3008 = vst [vmem:[#allocation101_spill] sm:$0xff] %v2528_v50  ;;  %v2530_v56 = vld [vmem:[#allocation10 + $0x3c0] sm:$0xff]  ;;  %v2532_v57 = vld [vmem:[#allocation10 + $0x3c8] sm:$0xff] }
  0x91   :  { %3009 = vst [vmem:[#allocation102_spill] sm:$0xff] %v2530_v56  ;;  %3010 = vst [vmem:[#allocation103_spill] sm:$0xff] %v2532_v57  ;;  %v2534_v58 = vld [vmem:[#allocation10 + $0x3d0] sm:$0xff]  ;;  %v2536_v59 = vld [vmem:[#allocation10 + $0x3d8] sm:$0xff] }
  0x92   :  { %3011 = vst [vmem:[#allocation104_spill] sm:$0xff] %v2534_v58  ;;  %3012 = vst [vmem:[#allocation105_spill] sm:$0xff] %v2536_v59  ;;  %v2538_v60 = vld [vmem:[#allocation10 + $0x3e0] sm:$0xff]  ;;  %v2540_v61 = vld [vmem:[#allocation10 + $0x3e8] sm:$0xff] }
  0x93   :  { %3013 = vst [vmem:[#allocation106_spill] sm:$0xff] %v2538_v60  ;;  %3014 = vst [vmem:[#allocation107_spill] sm:$0xff] %v2540_v61  ;;  %v2542_v62 = vld [vmem:[#allocation10 + $0x3f0] sm:$0xff]  ;;  %v2544_v63 = vld [vmem:[#allocation10 + $0x3f8] sm:$0xff] }
  0x94   :  { %3015 = vst [vmem:[#allocation108_spill] sm:$0xff] %v2542_v62  ;;  %3016 = vst [vmem:[#allocation109_spill] sm:$0xff] %v2544_v63  ;;  %v2546_v0 = vld [vmem:[#allocation10 + $0x400] sm:$0xff]  ;;  %v2548_v53 = vld [vmem:[#allocation10 + $0x408] sm:$0xff] }
  0x95   :  { %3017 = vst [vmem:[#allocation110_spill] sm:$0xff] %v2546_v0  ;;  %3018 = vst [vmem:[#allocation111_spill] sm:$0xff] %v2548_v53  ;;  %v2550_v50 = vld [vmem:[#allocation10 + $0x410] sm:$0xff]  ;;  %v2552_v56 = vld [vmem:[#allocation10 + $0x418] sm:$0xff] }
  0x96   :  { %3019 = vst [vmem:[#allocation112_spill] sm:$0xff] %v2550_v50  ;;  %3020 = vst [vmem:[#allocation113_spill] sm:$0xff] %v2552_v56  ;;  %v2554_v57 = vld [vmem:[#allocation10 + $0x420] sm:$0xff]  ;;  %v2556_v58 = vld [vmem:[#allocation10 + $0x428] sm:$0xff] }
  0x97   :  { %3021 = vst [vmem:[#allocation114_spill] sm:$0xff] %v2554_v57  ;;  %3022 = vst [vmem:[#allocation115_spill] sm:$0xff] %v2556_v58  ;;  %v2558_v59 = vld [vmem:[#allocation10 + $0x430] sm:$0xff]  ;;  %v2560_v60 = vld [vmem:[#allocation10 + $0x438] sm:$0xff] }
  0x98   :  { %3023 = vst [vmem:[#allocation116_spill] sm:$0xff] %v2558_v59  ;;  %3024 = vst [vmem:[#allocation117_spill] sm:$0xff] %v2560_v60  ;;  %v2562_v61 = vld [vmem:[#allocation10 + $0x440] sm:$0xff]  ;;  %v2564_v62 = vld [vmem:[#allocation10 + $0x448] sm:$0xff] }
  0x99   :  { %3025 = vst [vmem:[#allocation118_spill] sm:$0xff] %v2562_v61  ;;  %3026 = vst [vmem:[#allocation119_spill] sm:$0xff] %v2564_v62  ;;  %v2566_v63 = vld [vmem:[#allocation10 + $0x450] sm:$0xff]  ;;  %v2568_v0 = vld [vmem:[#allocation10 + $0x458] sm:$0xff] }
  0x9a   :  { %3027 = vst [vmem:[#allocation120_spill] sm:$0xff] %v2566_v63  ;;  %3028 = vst [vmem:[#allocation121_spill] sm:$0xff] %v2568_v0  ;;  %v2570_v53 = vld [vmem:[#allocation10 + $0x460] sm:$0xff]  ;;  %v2572_v50 = vld [vmem:[#allocation10 + $0x468] sm:$0xff] }
  0x9b   :  { %3029 = vst [vmem:[#allocation122_spill] sm:$0xff] %v2570_v53  ;;  %3030 = vst [vmem:[#allocation123_spill] sm:$0xff] %v2572_v50  ;;  %v2574_v56 = vld [vmem:[#allocation10 + $0x470] sm:$0xff]  ;;  %v2576_v57 = vld [vmem:[#allocation10 + $0x478] sm:$0xff] }
  0x9c   :  { %3031 = vst [vmem:[#allocation124_spill] sm:$0xff] %v2574_v56  ;;  %3032 = vst [vmem:[#allocation125_spill] sm:$0xff] %v2576_v57  ;;  %v111_v58 = vld [vmem:[#allocation9 + $0x8] sm:$0xff]  ;;  %v114_v59 = vld [vmem:[#allocation9 + $0x20] sm:$0xff] }
  0x9d   :  { %v1690_v55 = vpack.c.bf16 %v114_v59, %v111_v58  ;;  %v110_v60 = vld [vmem:[#allocation9] sm:$0xff]  ;;  %v113_v52 = vld [vmem:[#allocation9 + $0x18] sm:$0xff]  ;;  %v120_v62 = vld [vmem:[#allocation9 + $0x50] sm:$0xff] }
  0x9e   :  { %v117_v61 = vld [vmem:[#allocation9 + $0x38] sm:$0xff]  ;;  %v1692_v54 = vpack.c.bf16 %v113_v52, %v110_v60  ;;  %v116_v51 = vld [vmem:[#allocation9 + $0x30] sm:$0xff]  ;;  %v119_v63 = vld [vmem:[#allocation9 + $0x48] sm:$0xff] }
  0x9f   :  { %1691 = vmatprep.subr.bf16.mxu0 %v1690_v55  ;;  %v1694_v0 = vpack.c.bf16 %v120_v62, %v117_v61  ;;  %v123_v47 = vld [vmem:[#allocation9 + $0x68] sm:$0xff]  ;;  %v126_v53 = vld [vmem:[#allocation9 + $0x80] sm:$0xff]  ;;  %v1696_v50 = vpack.c.bf16 %v119_v63, %v116_v51  ;;  %v125_v57 = vld [vmem:[#allocation9 + $0x78] sm:$0xff] }
  0xa0   :  { %1693 = vmatpush1.bf16.msra.mxu0 %v1692_v54  ;;  %v1698_v56 = vpack.c.bf16 %v126_v53, %v123_v47  ;;  %v122_v44 = vld [vmem:[#allocation9 + $0x60] sm:$0xff]  ;;  %v112_v49 = vld [vmem:[#allocation9 + $0x10] sm:$0xff]  ;;  %v129_v46 = vld [vmem:[#allocation9 + $0x98] sm:$0xff] }
  0xa1   :  { %1695 = vmatprep.subr.bf16.mxu0 %v1694_v0  ;;  %v132_v58 = vld [vmem:[#allocation9 + $0xb0] sm:$0xff]  ;;  %v115_v59 = vld [vmem:[#allocation9 + $0x28] sm:$0xff]  ;;  %v118_v45 = vld [vmem:[#allocation9 + $0x40] sm:$0xff]  ;;  %v1700_v52 = vpack.c.bf16 %v125_v57, %v122_v44 }
  0xa2   :  { %v1722_v48 = vpack.c.bf16 %v115_v59, %v112_v49  ;;  %v121_v60 = vld [vmem:[#allocation9 + $0x58] sm:$0xff]  ;;  %v1702_v55 = vpack.c.bf16 %v132_v58, %v129_v46  ;;  %v128_v61 = vld [vmem:[#allocation9 + $0x90] sm:$0xff]  ;;  %v131_v62 = vld [vmem:[#allocation9 + $0xa8] sm:$0xff] }
  0xa3   :  { %v1726_v54 = vpack.c.bf16 %v121_v60, %v118_v45  ;;  %v124_v51 = vld [vmem:[#allocation9 + $0x70] sm:$0xff]  ;;  %v135_v0 = vld [vmem:[#allocation9 + $0xc8] sm:$0xff]  ;;  %v138_v47 = vld [vmem:[#allocation9 + $0xe0] sm:$0xff]  ;;  %v1704_v41 = vpack.c.bf16 %v131_v62, %v128_v61 }
  0xa4   :  { %1697 = vmatpush1.bf16.msra.mxu0 %v1696_v50  ;;  %1723 = vmatprep.subr.bf16.mxu1 %v1722_v48  ;;  %v127_v53 = vld [vmem:[#allocation9 + $0x88] sm:$0xff]  ;;  %v130_v49 = vld [vmem:[#allocation9 + $0xa0] sm:$0xff]  ;;  %v133_v59 = vld [vmem:[#allocation9 + $0xb8] sm:$0xff]  ;;  %v1706_v44 = vpack.c.bf16 %v138_v47, %v135_v0 }
  0xa5   :  { %1699 = vmatprep.subr.bf16.mxu0 %v1698_v56  ;;  %1725 = vmatpush3.bf16.msra.mxu1 %v1722_v48  ;;  %v1730_v63 = vpack.c.bf16 %v127_v53, %v124_v51  ;;  %v134_v50 = vld [vmem:[#allocation9 + $0xc0] sm:$0xff]  ;;  %v137_v56 = vld [vmem:[#allocation9 + $0xd8] sm:$0xff]  ;;  %v144_v57 = vld [vmem:[#allocation9 + $0x110] sm:$0xff]  ;;  %v1734_v45 = vpack.c.bf16 %v133_v59, %v130_v49 }
  0xa6   :  { %1727 = vmatprep.subr.bf16.mxu1 %v1726_v54  ;;  %v141_v46 = vld [vmem:[#allocation9 + $0xf8] sm:$0xff]  ;;  %v1708_v48 = vpack.c.bf16 %v137_v56, %v134_v50  ;;  %v136_v60 = vld [vmem:[#allocation9 + $0xd0] sm:$0xff]  ;;  %v139_v38 = vld [vmem:[#allocation9 + $0xe8] sm:$0xff] }
  0xa7   :  { %v102_v58 = vld [vmem:[#allocation4] sm:$0xff]  ;;  %v140_v61 = vld [vmem:[#allocation9 + $0xf0] sm:$0xff]  ;;  %v143_v62 = vld [vmem:[#allocation9 + $0x108] sm:$0xff]  ;;  %v1738_v0 = vpack.c.bf16 %v139_v38, %v136_v60 }
  0xa8   :  { %1701 = vmatpush1.bf16.msra.mxu0 %v1700_v52  ;;  %1505 = vmatprep.mubr.f32.mxu1 %v102_v58  ;;  %v1710_v52 = vpack.c.bf16 %v144_v57, %v141_v46  ;;  %v147_v51 = vld [vmem:[#allocation9 + $0x128] sm:$0xff]  ;;  %v1712_v47 = vpack.c.bf16 %v143_v62, %v140_v61  ;;  %v145_v53 = vld [vmem:[#allocation9 + $0x118] sm:$0xff]  ;;  %v146_v59 = vld [vmem:[#allocation9 + $0x120] sm:$0xff] }
  0xa9   :  { %1703 = vmatprep.subr.bf16.mxu0 %v1702_v55  ;;  %1729 = vmatpush3.bf16.msra.mxu1 %v1726_v54  ;;  %v150_v55 = vld [vmem:[#allocation9 + $0x140] sm:$0xff]  ;;  %v153_v50 = vld [vmem:[#allocation9 + $0x158] sm:$0xff]  ;;  %v156_v56 = vld [vmem:[#allocation9 + $0x170] sm:$0xff] }
  0xaa   :  { %1731 = vmatprep.subr.bf16.mxu1 %v1730_v63  ;;  %v142_v54 = vld [vmem:[#allocation9 + $0x100] sm:$0xff]  ;;  %v1714_v49 = vpack.c.bf16 %v150_v55, %v147_v51  ;;  %v148_v57 = vld [vmem:[#allocation9 + $0x130] sm:$0xff]  ;;  %v151_v43 = vld [vmem:[#allocation9 + $0x148] sm:$0xff]  ;;  %v3033_v51 = vmov 0.0  }
  0xab   :  { %v152_v38 = vld [vmem:[#allocation9 + $0x150] sm:$0xff]  ;;  %v1746_v60 = vpack.c.bf16 %v151_v43, %v148_v57  ;;  %v154_v61 = vld [vmem:[#allocation9 + $0x160] sm:$0xff]  ;;  %v157_v62 = vld [vmem:[#allocation9 + $0x178] sm:$0xff] }
  0xac   :  { %1705 = vmatpush1.bf16.msra.mxu0 %v1704_v41  ;;  %v149_v41 = vld [vmem:[#allocation9 + $0x138] sm:$0xff]  ;;  %v103_v55 = vld [vmem:[#allocation4 + $0x8] sm:$0xff]  ;;  %v104_v43 = vld [vmem:[#allocation4 + $0x10] sm:$0xff] }
  0xad   :  { %1707 = vmatprep.subr.bf16.mxu0 %v1706_v44  ;;  %1733 = vmatpush3.bf16.msra.mxu1 %v1730_v63  ;;  %v1742_v44 = vpack.c.bf16 %v145_v53, %v142_v54  ;;  %v1716_v46 = vpack.c.bf16 %v149_v41, %v146_v59  ;;  %v1718_v63 = vpack.c.bf16 %v156_v56, %v153_v50  ;;  %v108_v54 = vld [vmem:[#allocation4 + $0x30] sm:$0xff]  ;;  %v109_v53 = vld [vmem:[#allocation4 + $0x38] sm:$0xff]  ;;  %v2592_v56 = vld [vmem:[%s2915_s5 + $0x3] sm:$0x7] }
  0xae   :  { %1735 = vmatprep.subr.bf16.mxu1 %v1734_v45 }
  0xb0   :  { %1709 = vmatpush1.bf16.msra.mxu0 %v1708_v48  ;;  %v155_v48 = vld [vmem:[#allocation9 + $0x168] sm:$0xff] }
  0xb1   :  { %1711 = vmatprep.subr.bf16.mxu0 %v1710_v52  ;;  %1737 = vmatpush3.bf16.msra.mxu1 %v1734_v45  ;;  %v1720_v52 = vpack.c.bf16 %v155_v48, %v152_v38  ;;  %v1750_v45 = vpack.c.bf16 %v157_v62, %v154_v61  ;;  %v158_v61 = vld [vmem:[%s2913_s3] sm:$0x7]  ;;  %s2642_s3 = smov 0  }
  0xb2   :  { %1739 = vmatprep.subr.bf16.mxu1 %v1738_v0 }
  0xb4   :  { %1713 = vmatpush1.bf16.msra.mxu0 %v1712_v47  ;;  %v106_v47 = vld [vmem:[#allocation4 + $0x20] sm:$0xff] }
  0xb5   :  { %1715 = vmatprep.subr.bf16.mxu0 %v1714_v49  ;;  %1741 = vmatpush3.bf16.msra.mxu1 %v1738_v0  ;;  %v105_v0 = vld [vmem:[#allocation4 + $0x18] sm:$0xff]  ;;  %v160_v49 = vlaneseq }
  0xb6   :  { %1743 = vmatprep.subr.bf16.mxu1 %v1742_v44 }
  0xb7   :  { %v161_v59 = vshrl.u32 %v160_v49, 7 }
  0xb8   :  { %1717 = vmatpush1.bf16.msra.mxu0 %v1716_v46 }
  0xb9   :  { %1719 = vmatprep.subr.bf16.mxu0 %v1718_v63  ;;  %1745 = vmatpush3.bf16.msra.mxu1 %v1742_v44  ;;  %v2585_v41 = vsub.s32 0, %v161_v59  ;;  %v2587_v50 = vsub.s32 1, %v161_v59  ;;  %v2597_v44 = vld [vmem:[%s2915_s5 + $0x6] sm:$0x7]  ;;  %v2607_v48 = vsub.s32 2, %v161_v59 }
  0xba   :  { %1747 = vmatprep.subr.bf16.mxu1 %v1746_v60 }
  0xbb   :  { %v2617_v62 = vrot.slane %v158_v61, %v2585_v41 }
  0xbc   :  { %1721 = vmatpush1.bf16.msra.mxu0 %v1720_v52 }
  0xbd   :  { %1749 = vmatpush3.bf16.msra.mxu1 %v1746_v60 }
  0xbe   :  { %1751 = vmatprep.subr.bf16.mxu1 %v1750_v45 }
  0xbf   :  { %240 = vmatmul.mubr.f32.vlgmr.msra.gmra.mrb[0].mxu0 %v102_v58  ;;  %v107_v58 = vld [vmem:[#allocation4 + $0x28] sm:$0xff] }
  0xc0   :  { %245 = vmatprep.mubr.f32.mxu0 %v3033_v51 }
  0xc1   :  { %1753 = vmatpush3.bf16.msra.mxu1 %v1750_v45  ;;  %v2620_v45 = vrot.slane %v158_v61, %v2587_v50 }
  0xc3   :  { %246 = vmatmul.mubr.f32.gmra.mrb[2].mxu0 %v103_v55 }
  0xc4   :  { %251 = vmatprep.mubr.f32.mxu0 %v3033_v51  ;;  %1506 = vmatmul.mubr.f32.vlgmr.msra.gmra.mrb[0].mxu1 %v103_v55 }
  0xc5   :  { %1508 = vmatprep.mubr.f32.mxu1 %v104_v43 }
  0xc7   :  { %252 = vmatmul.mubr.f32.gmra.mrb[4].mxu0 %v104_v43 }
  0xc8   :  { %257 = vmatprep.mubr.f32.mxu0 %v3033_v51  ;;  %1509 = vmatmul.mubr.f32.gmra.mrb[2].mxu1 %v105_v0 }
  0xc9   :  { %1511 = vmatprep.mubr.f32.mxu1 %v106_v47 }
  0xcb   :  { %258 = vmatmul.mubr.f32.gmra.mrb[6].mxu0 %v105_v0 }
  0xcc   :  { %263 = vmatprep.mubr.f32.mxu0 %v3033_v51  ;;  %1512 = vmatmul.mubr.f32.gmra.mrb[4].mxu1 %v107_v58 }
  0xcd   :  { %1514 = vmatprep.mubr.f32.mxu1 %v108_v54 }
  0xcf   :  { %264 = vmatmul.mubr.f32.gmra.mrb[8].mxu0 %v106_v47  ;;  %v171_v47 = vrot.slane %v158_v61, %v2607_v48 }
  0xd0   :  { %269 = vmatprep.mubr.f32.mxu0 %v3033_v51  ;;  %1515 = vmatmul.mubr.f32.gmra.mrb[6].mxu1 %v109_v53 }
  0xd3   :  { %270 = vmatmul.mubr.f32.gmra.mrb[10].mxu0 %v107_v58 }
  0xd4   :  { %275 = vmatprep.mubr.f32.mxu0 %v3033_v51 }
  0xd7   :  { %276 = vmatmul.mubr.f32.gmra.mrb[12].mxu0 %v108_v54 }
  0xd8   :  { %281 = vmatprep.mubr.f32.mxu0 %v3033_v51 }
  0xdb   :  { %282 = vmatmul.mubr.f32.gmra.mrb[14].mxu0 %v109_v53 }
 0x192   :  { %v241_v51 = vpop.f32.mrb[0].mxu0 }
 0x193   :  { %v242_v55 = vadd.f32 %v241_v51, %v2617_v62  ;;  %v243_v43 = vpop.f32.mrb[1].mxu0 }
 0x194   :  { %v244_v0 = vadd.f32 %v243_v43, %v2620_v45 }
 0x195   :  { %393 = vst [vmem:[#allocation3] sm:$0xff] %v242_v55 }
 0x196   :  { %394 = vst [vmem:[#allocation3 + $0x8] sm:$0xff] %v244_v0  ;;  %v247_v58 = vpop.f32.mrb[2].mxu0 }
 0x197   :  { %v248_v54 = vadd.f32 %v247_v58, %v2617_v62  ;;  %v249_v53 = vpop.f32.mrb[3].mxu0  ;;  %v1507_v59 = vpop.f32.mrb[0].mxu1 }
 0x198   :  { %v250_v49 = vadd.f32 %v249_v53, %v2620_v45  ;;  %v360_v38 = vadd.f32 %v1507_v59, %v171_v47  ;;  %v354_v52 = vpop.f32.mrb[1].mxu1 }
 0x199   :  { %396 = vst [vmem:[#allocation3 + $0x18] sm:$0xff] %v248_v54  ;;  %v355_v51 = vadd.f32 %v354_v52, %v171_v47 }
 0x19a   :  { %397 = vst [vmem:[#allocation3 + $0x20] sm:$0xff] %v250_v49  ;;  %v253_v57 = vpop.f32.mrb[4].mxu0  ;;  %398 = vst [vmem:[#allocation3 + $0x28] sm:$0xff] %v360_v38 }
 0x19b   :  { %v254_v63 = vadd.f32 %v253_v57, %v2617_v62  ;;  %v255_v43 = vpop.f32.mrb[5].mxu0  ;;  %395 = vst [vmem:[#allocation3 + $0x10] sm:$0xff] %v355_v51  ;;  %v1510_v55 = vpop.f32.mrb[2].mxu1 }
 0x19c   :  { %v256_v61 = vadd.f32 %v255_v43, %v2620_v45  ;;  %v370_v0 = vadd.f32 %v1510_v55, %v171_v47  ;;  %v364_v58 = vpop.f32.mrb[3].mxu1 }
 0x19d   :  { %399 = vst [vmem:[#allocation3 + $0x30] sm:$0xff] %v254_v63  ;;  %v365_v60 = vadd.f32 %v364_v58, %v171_v47 }
 0x19e   :  { %400 = vst [vmem:[#allocation3 + $0x38] sm:$0xff] %v256_v61  ;;  %v259_v53 = vpop.f32.mrb[6].mxu0  ;;  %404 = vst [vmem:[#allocation3 + $0x58] sm:$0xff] %v370_v0 }
 0x19f   :  { %v260_v54 = vadd.f32 %v259_v53, %v2617_v62  ;;  %v261_v59 = vpop.f32.mrb[7].mxu0  ;;  %401 = vst [vmem:[#allocation3 + $0x40] sm:$0xff] %v365_v60  ;;  %v1513_v57 = vpop.f32.mrb[4].mxu1 }
 0x1a0   :  { %v262_v52 = vadd.f32 %v261_v59, %v2620_v45  ;;  %v380_v38 = vadd.f32 %v1513_v57, %v171_v47  ;;  %v374_v49 = vpop.f32.mrb[5].mxu1 }
 0x1a1   :  { %402 = vst [vmem:[#allocation3 + $0x48] sm:$0xff] %v260_v54  ;;  %v375_v43 = vadd.f32 %v374_v49, %v171_v47 }
 0x1a2   :  { %403 = vst [vmem:[#allocation3 + $0x50] sm:$0xff] %v262_v52  ;;  %v265_v51 = vpop.f32.mrb[8].mxu0  ;;  %410 = vst [vmem:[#allocation3 + $0x88] sm:$0xff] %v380_v38 }
 0x1a3   :  { %v266_v63 = vadd.f32 %v265_v51, %v2617_v62  ;;  %v267_v55 = vpop.f32.mrb[9].mxu0  ;;  %407 = vst [vmem:[#allocation3 + $0x70] sm:$0xff] %v375_v43  ;;  %v1516_v58 = vpop.f32.mrb[6].mxu1 }
 0x1a4   :  { %v268_v61 = vadd.f32 %v267_v55, %v2620_v45  ;;  %v390_v0 = vadd.f32 %v1516_v58, %v171_v47  ;;  %v384_v53 = vpop.f32.mrb[7].mxu1 }
 0x1a5   :  { %405 = vst [vmem:[#allocation3 + $0x60] sm:$0xff] %v266_v63  ;;  %v385_v59 = vadd.f32 %v384_v53, %v171_v47 }
 0x1a6   :  { %406 = vst [vmem:[#allocation3 + $0x68] sm:$0xff] %v268_v61  ;;  %v271_v60 = vpop.f32.mrb[10].mxu0  ;;  %416 = vst [vmem:[#allocation3 + $0xb8] sm:$0xff] %v390_v0 }
 0x1a7   :  { %v272_v54 = vadd.f32 %v271_v60, %v2617_v62  ;;  %v273_v57 = vpop.f32.mrb[11].mxu0  ;;  %413 = vst [vmem:[#allocation3 + $0xa0] sm:$0xff] %v385_v59 }
 0x1a8   :  { %v274_v52 = vadd.f32 %v273_v57, %v2620_v45 }
 0x1a9   :  { %408 = vst [vmem:[#allocation3 + $0x78] sm:$0xff] %v272_v54 }
 0x1aa   :  { %409 = vst [vmem:[#allocation3 + $0x80] sm:$0xff] %v274_v52  ;;  %v277_v38 = vpop.f32.mrb[12].mxu0 }
 0x1ab   :  { %v278_v49 = vadd.f32 %v277_v38, %v2617_v62  ;;  %v279_v51 = vpop.f32.mrb[13].mxu0 }
 0x1ac   :  { %v280_v43 = vadd.f32 %v279_v51, %v2620_v45 }
 0x1ad   :  { %411 = vst [vmem:[#allocation3 + $0x90] sm:$0xff] %v278_v49 }
 0x1ae   :  { %412 = vst [vmem:[#allocation3 + $0x98] sm:$0xff] %v280_v43  ;;  %v283_v63 = vpop.f32.mrb[14].mxu0 }
 0x1af   :  { %v284_v47 = vadd.f32 %v283_v63, %v2617_v62  ;;  %v285_v55 = vpop.f32.mrb[15].mxu0 }
 0x1b0   :  { %v286_v61 = vadd.f32 %v285_v55, %v2620_v45 }
 0x1b1   :  { %414 = vst [vmem:[#allocation3 + $0xa8] sm:$0xff] %v284_v47 }
 0x1b2   :  { %415 = vst [vmem:[#allocation3 + $0xb0] sm:$0xff] %v286_v61 }
 0x1b3 LB: > { %v3034_v3 = vld [vmem:[#allocation19_spill] sm:$0xff]  ;;  %v3035_v2 = vld [vmem:[#allocation18_spill] sm:$0xff]  ;;  %v3036_v4 = vld [vmem:[#allocation20_spill] sm:$0xff]  ;;  %v2923_v0 = vmov 0.0|0.0   ;;  %v1758_v53 = vpack.c.bf16 %v2310_v12, %v2304_v9  ;;  %v1790_v60 = vpack.c.bf16 %v2312_v13, %v2306_v10  ;;  %v1760_v59 = vpack.c.bf16 %v2308_v11, %v2302_v8  ;;  %s1357_s26 = smul.u32 24, %s2154_s3  ;;  %s1351_s1 = sshll.u32 %s2154_s3, 3  ;;  %s2154_s3 = sphi %s2642_s3, %s605_s3   ;;  %v2150_v1 = vphi %v2288_v1, %v1050_v1  }
 0x1b4   : > { %v1754_v62 = vpack.c.bf16 %v2298_v6, %v3034_v3  ;;  %v1756_v45 = vpack.c.bf16 %v2296_v5, %v3035_v2  ;;  %v1787_v58 = vpack.c.bf16 %v2300_v7, %v3036_v4  ;;  %1786 = vmatprep.subr.bf16.mxu1 %v2923_v0  ;;  %v1762_v54 = vpack.c.bf16 %v2322_v18, %v2316_v15  ;;  %v3100_v2 = vld [vmem:[#allocation85_spill] sm:$0xff]  ;;  %v3101_v3 = vld [vmem:[#allocation88_spill] sm:$0xff]  ;;  %s2784_s30 = scalar_lea.vmem [#allocation13], %s1351_s1  ;;  %s605_s3 = sadd.s32 1, %s2154_s3  }
 0x1b5   : > { %v2921_v57 = vmov 0.0   ;;  %v1793_v52 = vpack.c.bf16 %v2324_v19, %v2318_v16  ;;  %vm2168_vm0 = vmmov 0   ;;  %v1764_v38 = vpack.c.bf16 %v2320_v17, %v2314_v14  ;;  %s609_s27 = scalar_lea.vmem [#allocation3], %s1357_s26  ;;  %p602_p12 = scmp.ge.s32.totalorder %s605_s3, 8  }
 0x1b6   : > { %1755 = vmatprep.subr.bf16.mxu0 %v1754_v62  ;;  %1788 = vmatpush3.bf16.msra.mxu1 %v1787_v58  ;;  %v1766_v49 = vpack.c.bf16 %v2334_v24, %v2328_v21  ;;  %v1796_v51 = vpack.c.bf16 %v2336_v25, %v2330_v22  ;;  %v1768_v43 = vpack.c.bf16 %v2332_v23, %v2326_v20  ;;  %v1087_v6 = vld [vmem:[#allocation12 + $0x40] sm:$0xff] (%p602_p12)  ;;  %v1088_v7 = vld [vmem:[#allocation12 + $0x48] sm:$0xff] (%p602_p12)  ;;  %v1089_v9 = vld [vmem:[#allocation12 + $0x50] sm:$0xff] (%p602_p12) }
 0x1b7   : > { %1757 = vmatpush1.bf16.msra.mxu0 %v1756_v45  ;;  %1789 = vmatprep.subr.bf16.mxu1 %v2923_v0  ;;  %v1770_v63 = vpack.c.bf16 %v2346_v30, %v2340_v27  ;;  %v1799_v47 = vpack.c.bf16 %v2348_v31, %v2342_v28  ;;  %v1772_v55 = vpack.c.bf16 %v2344_v29, %v2338_v26  ;;  %v1090_v10 = vld [vmem:[#allocation12 + $0x58] sm:$0xff] (%p602_p12)  ;;  %v1091_v12 = vld [vmem:[#allocation12 + $0x60] sm:$0xff] (%p602_p12)  ;;  %v1092_v13 = vld [vmem:[#allocation12 + $0x68] sm:$0xff] (%p602_p12) }
 0x1b8   : > { %1759 = vmatprep.subr.bf16.mxu0 %v1758_v53  ;;  %677 = vmatprep.mubr.f32.mxu0 %v2921_v57  ;;  %v1774_v61 = vpack.c.bf16 %v2358_v36, %v2352_v33  ;;  %v1802_v62 = vpack.c.bf16 %v2360_v37, %v2354_v34  ;;  %v1776_v45 = vpack.c.bf16 %v2356_v35, %v2350_v32  ;;  %v3037_v53 = vld [vmem:[#allocation23_spill] sm:$0xff]  ;;  %v1093_v15 = vld [vmem:[#allocation12 + $0x70] sm:$0xff] (%p602_p12)  ;;  %v1094_v16 = vld [vmem:[#allocation12 + $0x78] sm:$0xff] (%p602_p12) }
 0x1b9   : > { %1549 = vmatprep.mubr.msk.f32.mxu1 %vm2168_vm0, %v2921_v57  ;;  %v1778_v58 = vpack.c.bf16 %v2370_v42, %v2364_v39  ;;  %v1870_v4 = vpack.c.bf16 %v3101_v3, %v3100_v2  ;;  %v3107_v2 = vld [vmem:[#allocation91_spill] sm:$0xff]  ;;  %v3108_v3 = vld [vmem:[#allocation94_spill] sm:$0xff]  ;;  %v1938_v8 = vpack.c.bf16 (%p602_p12), %v1088_v7, %v1087_v6  ;;  %v1942_v11 = vpack.c.bf16 (%p602_p12), %v1090_v10, %v1089_v9  ;;  %v2869_v42 = vld [vmem:[%s2917_s7] ss:$0 sm:$0xff] (%p602_p12)  ;;  %s2169_s7 = smov (%p602_p12), [#allocation13]  }
 0x1ba   : > { %1791 = vmatpush3.bf16.msra.mxu1 %v1790_v60  ;;  %v1805_v60 = vpack.c.bf16 %v3037_v53, %v2366_v40  ;;  %v3047_v53 = vld [vmem:[#allocation34_spill] sm:$0xff]  ;;  %v1946_v14 = vpack.c.bf16 (%p602_p12), %v1092_v13, %v1091_v12  ;;  %v1950_v17 = vpack.c.bf16 (%p602_p12), %v1094_v16, %v1093_v15  ;;  %s1316_s11 = sshll.u32 (%p602_p12), %s2169_s7, 4  ;;  %s1317_s11 = int_to_ptr.vmem [resolvable:$true] %s1316_s11 }
 0x1bb   : > { %1761 = vmatpush1.bf16.msra.mxu0 %v1760_v59  ;;  %1792 = vmatprep.subr.bf16.mxu1 %v2923_v0  ;;  %v3038_v59 = vld [vmem:[#allocation21_spill] sm:$0xff]  ;;  %s2110_s0 = scalar_lea.vmem (%p602_p12), %s1317_s11, 3072  ;;  %p2115_p0 = scmp.lt.s32.totalorder (%p602_p12), %s1317_s11, %s1317_s11 }
 0x1bc   : > { %1763 = vmatprep.subr.bf16.mxu0 %v1762_v54  ;;  %v3039_v54 = vld [vmem:[#allocation22_spill] sm:$0xff]  ;;  %p2111_p13 = scmp.ne.s32.totalorder (%p602_p12), %s1317_s11, %s2110_s0  ;;  %p2116_p1 = scmp.lt.s32.totalorder (%p602_p12), %s2110_s0, %s2110_s0 }
 0x1be   : > { %1794 = vmatpush3.bf16.msra.mxu1 %v1793_v52  ;;  %v1780_v52 = vpack.c.bf16 %v3039_v54, %v3038_v59  ;;  %v3048_v59 = vld [vmem:[#allocation32_spill] sm:$0xff]  ;;  %p2117_p2 = por (%p602_p12), %p2116_p1, %p2115_p0 }
 0x1bf   : > { %1765 = vmatpush1.bf16.msra.mxu0 %v1764_v38  ;;  %1795 = vmatprep.subr.bf16.mxu1 %v2923_v0  ;;  %v3040_v38 = vld [vmem:[#allocation25_spill] sm:$0xff] }
 0x1c0   : > { %1767 = vmatprep.subr.bf16.mxu0 %v1766_v49  ;;  %v3041_v49 = vld [vmem:[#allocation28_spill] sm:$0xff]  ;;  %p2118_p3 = pnand (%p602_p12), %p2117_p2, %p2111_p13 }
 0x1c2   : > { %1797 = vmatpush3.bf16.msra.mxu1 %v1796_v51  ;;  %v1782_v51 = vpack.c.bf16 %v3041_v49, %v3040_v38  ;;  %v3051_v38 = vld [vmem:[#allocation33_spill] sm:$0xff] }
 0x1c3   : > { %1769 = vmatpush1.bf16.msra.mxu0 %v1768_v43  ;;  %1798 = vmatprep.subr.bf16.mxu1 %v2923_v0  ;;  %v3042_v43 = vld [vmem:[#allocation26_spill] sm:$0xff] }
 0x1c4   : > { %1771 = vmatprep.subr.bf16.mxu0 %v1770_v63  ;;  %v3043_v63 = vld [vmem:[#allocation29_spill] sm:$0xff] }
 0x1c6   : > { %1800 = vmatpush3.bf16.msra.mxu1 %v1799_v47  ;;  %v1808_v47 = vpack.c.bf16 %v3043_v63, %v3042_v43  ;;  %v3053_v43 = vld [vmem:[#allocation40_spill] sm:$0xff] }
 0x1c7   : > { %1773 = vmatpush1.bf16.msra.mxu0 %v1772_v55  ;;  %1801 = vmatprep.subr.bf16.mxu1 %v2923_v0  ;;  %v3044_v55 = vld [vmem:[#allocation24_spill] sm:$0xff] }
 0x1c8   : > { %1775 = vmatprep.subr.bf16.mxu0 %v1774_v61  ;;  %v3045_v61 = vld [vmem:[#allocation27_spill] sm:$0xff] }
 0x1ca   : > { %1803 = vmatpush3.bf16.msra.mxu1 %v1802_v62  ;;  %v1784_v62 = vpack.c.bf16 %v3045_v61, %v3044_v55  ;;  %v3056_v61 = vld [vmem:[#allocation36_spill] sm:$0xff] }
 0x1cb   : > { %1777 = vmatpush1.bf16.msra.mxu0 %v1776_v45  ;;  %1804 = vmatprep.subr.bf16.mxu1 %v2923_v0  ;;  %v3046_v45 = vld [vmem:[#allocation31_spill] sm:$0xff] }
 0x1cc   : > { %1779 = vmatprep.subr.bf16.mxu0 %v1778_v58  ;;  %v1810_v46 = vpack.c.bf16 %v3047_v53, %v3046_v45  ;;  %v3049_v58 = vld [vmem:[#allocation35_spill] sm:$0xff] }
 0x1cd   : > { %v1843_v54 = vpack.c.bf16 %v3049_v58, %v3048_v59  ;;  %v3058_v53 = vld [vmem:[#allocation43_spill] sm:$0xff]  ;;  %v3060_v58 = vld [vmem:[#allocation44_spill] sm:$0xff] }
 0x1ce   : > { %1806 = vmatpush3.bf16.msra.mxu1 %v1805_v60  ;;  %v3050_v60 = vld [vmem:[#allocation30_spill] sm:$0xff] }
 0x1cf   : > { %1781 = vmatpush1.bf16.msra.mxu0 %v1780_v52  ;;  %1807 = vmatprep.subr.bf16.mxu1 %v2923_v0  ;;  %v1812_v49 = vpack.c.bf16 %v3051_v38, %v3050_v60  ;;  %v3052_v52 = vld [vmem:[#allocation37_spill] sm:$0xff]  ;;  %v3062_v38 = vld [vmem:[#allocation42_spill] sm:$0xff] }
 0x1d0   : > { %1783 = vmatprep.subr.bf16.mxu0 %v1782_v51  ;;  %v1814_v63 = vpack.c.bf16 %v3053_v43, %v3052_v52  ;;  %v3054_v51 = vld [vmem:[#allocation38_spill] sm:$0xff]  ;;  %v3064_v43 = vld [vmem:[#allocation49_spill] sm:$0xff] }
 0x1d2   : > { %1809 = vmatpush3.bf16.msra.mxu1 %v1808_v47  ;;  %v3055_v47 = vld [vmem:[#allocation41_spill] sm:$0xff] }
 0x1d3   : > { %1785 = vmatpush1.bf16.msra.mxu0 %v1784_v62  ;;  %1842 = vmatprep.subr.bf16.mxu1 %v2923_v0  ;;  %v1846_v55 = vpack.c.bf16 %v3055_v47, %v3054_v51  ;;  %v3057_v62 = vld [vmem:[#allocation39_spill] sm:$0xff]  ;;  %v3066_v47 = vld [vmem:[#allocation50_spill] sm:$0xff] }
 0x1d4   : > { %1811 = vmatprep.subr.bf16.mxu0 %v1810_v46  ;;  %v1816_v45 = vpack.c.bf16 %v3057_v62, %v3056_v61  ;;  %v3059_v46 = vld [vmem:[#allocation46_spill] sm:$0xff]  ;;  %v3067_v61 = vld [vmem:[#allocation53_spill] sm:$0xff] }
 0x1d5   : > { %1550 = vmatmul.mubr.f32.vlgmr.msra.gmra.mrb[0].mxu1 %v2150_v1  ;;  %v1818_v59 = vpack.c.bf16 %v3059_v46, %v3058_v53  ;;  %v1852_v62 = vpack.c.bf16 %v3067_v61, %v3066_v47  ;;  %v3069_v53 = vld [vmem:[#allocation51_spill] sm:$0xff]  ;;  %v3077_v47 = vld [vmem:[#allocation64_spill] sm:$0xff] }
 0x1d6   : > { %678 = vmatmul.mubr.f32.vlgmr.msra.gmra.mrb[0].mxu0 %v2150_v1  ;;  %1844 = vmatpush3.bf16.msra.mxu1 %v1843_v54  ;;  %v3061_v54 = vld [vmem:[#allocation47_spill] sm:$0xff] }
 0x1d7   : > { %1813 = vmatpush1.bf16.msra.mxu0 %v1812_v49  ;;  %1845 = vmatprep.subr.bf16.mxu1 %v2923_v0  ;;  %v1849_v60 = vpack.c.bf16 %v3061_v54, %v3060_v58  ;;  %v3063_v49 = vld [vmem:[#allocation45_spill] sm:$0xff]  ;;  %v3071_v58 = vld [vmem:[#allocation58_spill] sm:$0xff] }
 0x1d8   : > { %1815 = vmatprep.subr.bf16.mxu0 %v1814_v63  ;;  %824 = vmatprep.mubr.f32.mxu0 %v2921_v57  ;;  %v1820_v52 = vpack.c.bf16 %v3063_v49, %v3062_v38  ;;  %v3065_v63 = vld [vmem:[#allocation52_spill] sm:$0xff] }
 0x1d9   : > { %1584 = vmatprep.mubr.msk.f32.mxu1 %vm2168_vm0, %v2921_v57  ;;  %v1822_v51 = vpack.c.bf16 %v3065_v63, %v3064_v43  ;;  %v3072_v38 = vld [vmem:[#allocation56_spill] sm:$0xff]  ;;  %v3075_v43 = vld [vmem:[#allocation57_spill] sm:$0xff] }
 0x1da   : > { %1847 = vmatpush3.bf16.msra.mxu1 %v1846_v55  ;;  %v3068_v55 = vld [vmem:[#allocation48_spill] sm:$0xff] }
 0x1db   : > { %1817 = vmatpush1.bf16.msra.mxu0 %v1816_v45  ;;  %1848 = vmatprep.subr.bf16.mxu1 %v2923_v0  ;;  %v1824_v46 = vpack.c.bf16 %v3069_v53, %v3068_v55  ;;  %v3070_v45 = vld [vmem:[#allocation55_spill] sm:$0xff]  ;;  %v3078_v55 = vld [vmem:[#allocation62_spill] sm:$0xff] }
 0x1dc   : > { %1819 = vmatprep.subr.bf16.mxu0 %v1818_v59  ;;  %v1826_v54 = vpack.c.bf16 %v3071_v58, %v3070_v45  ;;  %v3073_v59 = vld [vmem:[#allocation59_spill] sm:$0xff] }
 0x1dd   : > { %v1855_v49 = vpack.c.bf16 %v3073_v59, %v3072_v38  ;;  %v3081_v45 = vld [vmem:[#allocation63_spill] sm:$0xff]  ;;  %v3084_v59 = vld [vmem:[#allocation66_spill] sm:$0xff] }
 0x1de   : > { %1850 = vmatpush3.bf16.msra.mxu1 %v1849_v60  ;;  %v3074_v60 = vld [vmem:[#allocation54_spill] sm:$0xff] }
 0x1df   : > { %1821 = vmatpush1.bf16.msra.mxu0 %v1820_v52  ;;  %1851 = vmatprep.subr.bf16.mxu1 %v2923_v0  ;;  %v1828_v63 = vpack.c.bf16 %v3075_v43, %v3074_v60  ;;  %v3076_v52 = vld [vmem:[#allocation61_spill] sm:$0xff]  ;;  %v3086_v43 = vld [vmem:[#allocation68_spill] sm:$0xff] }
 0x1e0   : > { %1823 = vmatprep.subr.bf16.mxu0 %v1822_v51  ;;  %v1830_v61 = vpack.c.bf16 %v3077_v47, %v3076_v52  ;;  %v3079_v51 = vld [vmem:[#allocation65_spill] sm:$0xff]  ;;  %v3087_v52 = vld [vmem:[#allocation71_spill] sm:$0xff] }
 0x1e1   : > { %v1858_v53 = vpack.c.bf16 %v3079_v51, %v3078_v55  ;;  %v3085_v60 = vld [vmem:[#allocation69_spill] sm:$0xff]  ;;  %v3089_v55 = vld [vmem:[#allocation76_spill] sm:$0xff] }
 0x1e2   : > { %1853 = vmatpush3.bf16.msra.mxu1 %v1852_v62  ;;  %v3080_v62 = vld [vmem:[#allocation60_spill] sm:$0xff]  ;;  %v3088_v47 = vld [vmem:[#allocation73_spill] sm:$0xff] }
 0x1e3   : > { %1825 = vmatpush1.bf16.msra.mxu0 %v1824_v46  ;;  %1854 = vmatprep.subr.bf16.mxu1 %v2923_v0  ;;  %v1832_v58 = vpack.c.bf16 %v3081_v45, %v3080_v62  ;;  %v3082_v46 = vld [vmem:[#allocation67_spill] sm:$0xff]  ;;  %v3090_v51 = vld [vmem:[#allocation72_spill] sm:$0xff]  ;;  %v3092_v45 = vld [vmem:[#allocation74_spill] sm:$0xff] }
 0x1e4   : > { %1827 = vmatprep.subr.bf16.mxu0 %v1826_v54  ;;  %v3083_v54 = vld [vmem:[#allocation70_spill] sm:$0xff] }
 0x1e5   : > { %v1834_v38 = vpack.c.bf16 %v3083_v54, %v3082_v46  ;;  %v3094_v54 = vld [vmem:[#allocation79_spill] sm:$0xff] }
 0x1e6   : > { %1856 = vmatpush3.bf16.msra.mxu1 %v1855_v49  ;;  %v1836_v49 = vpack.c.bf16 %v3085_v60, %v3084_v59  ;;  %v612_v60 = vld [vmem:[%s609_s27 + $0x10] sm:$0xff] }
 0x1e7   : > { %1829 = vmatpush1.bf16.msra.mxu0 %v1828_v63  ;;  %1857 = vmatprep.subr.bf16.mxu1 %v2923_v0  ;;  %v1861_v63 = vpack.c.bf16 %v3087_v52, %v3086_v43  ;;  %v611_v52 = vld [vmem:[%s609_s27 + $0x8] sm:$0xff] }
 0x1e8   : > { %1831 = vmatprep.subr.bf16.mxu0 %v1830_v61  ;;  %v1838_v61 = vpack.c.bf16 %v3089_v55, %v3088_v47 }
 0x1ea   : > { %1859 = vmatpush3.bf16.msra.mxu1 %v1858_v53  ;;  %v3091_v53 = vld [vmem:[#allocation75_spill] sm:$0xff] }
 0x1eb   : > { %1833 = vmatpush1.bf16.msra.mxu0 %v1832_v58  ;;  %1860 = vmatprep.subr.bf16.mxu1 %v2923_v0  ;;  %v1840_v62 = vpack.c.bf16 %v3091_v53, %v3090_v51  ;;  %v3093_v58 = vld [vmem:[#allocation77_spill] sm:$0xff] }
 0x1ec   : > { %1835 = vmatprep.subr.bf16.mxu0 %v1834_v38  ;;  %v1864_v46 = vpack.c.bf16 %v3093_v58, %v3092_v45  ;;  %v3095_v38 = vld [vmem:[#allocation82_spill] sm:$0xff] }
 0x1ed   : > { %v1866_v59 = vpack.c.bf16 %v3095_v38, %v3094_v54  ;;  %v3096_v58 = vld [vmem:[#allocation78_spill] sm:$0xff]  ;;  %v3098_v38 = vld [vmem:[#allocation80_spill] sm:$0xff] }
 0x1ee   : > { %1862 = vmatpush3.bf16.msra.mxu1 %v1861_v63 }
 0x1ef   : > { %1837 = vmatpush1.bf16.msra.mxu0 %v1836_v49  ;;  %1863 = vmatprep.subr.bf16.mxu1 %v2923_v0  ;;  %v610_v49 = vld [vmem:[%s609_s27] sm:$0xff] }
 0x1f0   : > { %1839 = vmatprep.subr.bf16.mxu0 %v1838_v61 }
 0x1f2   : > { %1865 = vmatpush3.bf16.msra.mxu1 %v1864_v46  ;;  %v3097_v46 = vld [vmem:[#allocation81_spill] sm:$0xff] }
 0x1f3   : > { %1841 = vmatpush1.bf16.msra.mxu0 %v1840_v62  ;;  %1898 = vmatprep.subr.bf16.mxu1 %v2923_v0  ;;  %v1868_v54 = vpack.c.bf16 %v3097_v46, %v3096_v58  ;;  %v3115_v46 = vld [vmem:[#allocation100_spill] sm:$0xff] }
 0x1f4   : > { %1867 = vmatprep.subr.bf16.mxu0 %v1866_v59  ;;  %v3099_v59 = vld [vmem:[#allocation83_spill] sm:$0xff] }
 0x1f5   : > { %v1899_v57 = vpack.c.bf16 %v3099_v59, %v3098_v38  ;;  %v3116_v38 = vld [vmem:[#allocation96_spill] sm:$0xff]  ;;  %v3117_v59 = vld [vmem:[#allocation99_spill] sm:$0xff] }
 0x2a8   : > { %v750_v43 = vpop.f32.mrb[0].mxu1 }
 0x2a9   : > { %v679_v63 = vpop.f32.mrb[0].mxu0  ;;  %v751_v47 = vadd.f32 %v750_v43, %v612_v60  ;;  %v1551_v55 = vpop.f32.mrb[1].mxu1  ;;  %v3103_v60 = vld [vmem:[#allocation87_spill] sm:$0xff]  ;;  %v3104_v43 = vld [vmem:[#allocation86_spill] sm:$0xff] }
 0x2aa   : > { %v680_v51 = vadd.f32 %v679_v63, %v610_v49  ;;  %v681_v61 = vpop.f32.mrb[1].mxu0  ;;  %v1874_v55 = vpack.c.bf16 %v3108_v3, %v3107_v2  ;;  %v3122_v3 = vld [vmem:[#allocation102_spill] sm:$0xff] }
 0x2ab   : > { %v755_v53 = vmul.f32 %v2150_v1, %v751_v47  ;;  %v682_v62 = vadd.f32 %v681_v61, %v611_v52  ;;  %v3102_v1 = vld [vmem:[#allocation84_spill] sm:$0xff]  ;;  %v3105_v52 = vld [vmem:[#allocation89_spill] sm:$0xff]  ;;  %v3106_v47 = vmov 0.0|0.0  }
 0x2ac   : > { %v1872_v49 = vpack.c.bf16 %v3103_v60, %v3102_v1  ;;  %v1902_v63 = vpack.c.bf16 %v3105_v52, %v3104_v43  ;;  %v3111_v61 = vld [vmem:[#allocation93_spill] sm:$0xff]  ;;  %v1880_v1 = vpack.c.bf16 %v3117_v59, %v3116_v38  ;;  %v3118_v60 = vld [vmem:[#allocation98_spill] sm:$0xff]  ;;  %v3120_v52 = vld [vmem:[#allocation103_spill] sm:$0xff] }
 0x2ad   : > { %v754_v45 = vmul.f32 %v682_v62, %v680_v51  ;;  %v3109_v51 = vmov 0.0   ;;  %v3112_v62 = vld [vmem:[#allocation92_spill] sm:$0xff]  ;;  %v3130_v38 = vld [vmem:[#allocation110_spill] sm:$0xff]  ;;  %v3131_v59 = vld [vmem:[#allocation113_spill] sm:$0xff] }
 0x2af   : > { %v2780_v0 = vadd.f32 %v755_v53, %v754_v45  ;;  %v3113_v45 = vld [vmem:[#allocation95_spill] sm:$0xff] }
 0x2b0   : > { %v1905_v58 = vpack.c.bf16 %v3113_v45, %v3112_v62  ;;  %v3126_v62 = vld [vmem:[#allocation109_spill] sm:$0xff]  ;;  %v3127_v45 = vld [vmem:[#allocation112_spill] sm:$0xff] }
 0x2b1   : > { %759 = vst [vmem:[%s2784_s30] sm:$0xff] %v2780_v0  ;;  %825 = vmatmul.mubr.f32.vlgmr.msra.gmra.mrb[2].mxu0 %v2780_v0  ;;  %1585 = vmatmul.mubr.f32.vlgmr.msra.gmra.mrb[2].mxu1 %v2780_v0 }
 0x2b2   : > { %1869 = vmatpush1.bf16.msra.mxu0 %v1868_v54  ;;  %1900 = vmatpush3.bf16.msra.mxu1 %v1899_v57  ;;  %v3110_v57 = vld [vmem:[#allocation90_spill] sm:$0xff] }
 0x2b3   : > { %1871 = vmatprep.subr.bf16.mxu0 %v1870_v4  ;;  %1901 = vmatprep.subr.bf16.mxu1 %v3106_v47  ;;  %v1876_v53 = vpack.c.bf16 %v3111_v61, %v3110_v57  ;;  %v3114_v4 = vld [vmem:[#allocation97_spill] sm:$0xff]  ;;  %v3124_v57 = vld [vmem:[#allocation104_spill] sm:$0xff]  ;;  %v3125_v61 = vld [vmem:[#allocation107_spill] sm:$0xff] }
 0x2b4   : > { %971 = vmatprep.mubr.f32.mxu0 %v3109_v51  ;;  %1619 = vmatprep.mubr.msk.f32.mxu1 %vm2168_vm0, %v3109_v51  ;;  %v1878_v54 = vpack.c.bf16 %v3115_v46, %v3114_v4  ;;  %v3128_v4 = vld [vmem:[#allocation108_spill] sm:$0xff]  ;;  %v3129_v46 = vld [vmem:[#allocation111_spill] sm:$0xff] }
 0x2b6   : > { %1873 = vmatpush1.bf16.msra.mxu0 %v1872_v49  ;;  %1903 = vmatpush3.bf16.msra.mxu1 %v1902_v63  ;;  %v3119_v49 = vld [vmem:[#allocation101_spill] sm:$0xff]  ;;  %v3121_v63 = vld [vmem:[#allocation106_spill] sm:$0xff] }
 0x2b7   : > { %1875 = vmatprep.subr.bf16.mxu0 %v1874_v55  ;;  %1904 = vmatprep.subr.bf16.mxu1 %v3106_v47  ;;  %v1908_v43 = vpack.c.bf16 %v3119_v49, %v3118_v60  ;;  %v1882_v2 = vpack.c.bf16 %v3121_v63, %v3120_v52  ;;  %v3123_v55 = vld [vmem:[#allocation105_spill] sm:$0xff]  ;;  %v3132_v60 = vld [vmem:[#allocation115_spill] sm:$0xff]  ;;  %v3133_v49 = vld [vmem:[#allocation118_spill] sm:$0xff] }
 0x2b8   : > { %v1884_v51 = vpack.c.bf16 %v3123_v55, %v3122_v3  ;;  %v3134_v52 = vld [vmem:[#allocation114_spill] sm:$0xff]  ;;  %v3135_v63 = vld [vmem:[#allocation117_spill] sm:$0xff]  ;;  %v3136_v3 = vld [vmem:[#allocation116_spill] sm:$0xff] }
 0x2b9   : > { %v3137_v55 = vld [vmem:[#allocation119_spill] sm:$0xff] }
 0x2ba   : > { %1877 = vmatpush1.bf16.msra.mxu0 %v1876_v53  ;;  %1906 = vmatpush3.bf16.msra.mxu1 %v1905_v58  ;;  %v1911_v53 = vpack.c.bf16 %v3125_v61, %v3124_v57  ;;  %v1886_v58 = vpack.c.bf16 %v3127_v45, %v3126_v62  ;;  %v3138_v57 = vld [vmem:[#allocation121_spill] sm:$0xff]  ;;  %v3139_v61 = vld [vmem:[#allocation124_spill] sm:$0xff]  ;;  %v3141_v45 = vld [vmem:[#allocation123_spill] sm:$0xff] }
 0x2bb   : > { %1879 = vmatprep.subr.bf16.mxu0 %v1878_v54  ;;  %1907 = vmatprep.subr.bf16.mxu1 %v3106_v47  ;;  %v1888_v54 = vpack.c.bf16 %v3129_v46, %v3128_v4  ;;  %v3140_v62 = vld [vmem:[#allocation120_spill] sm:$0xff]  ;;  %v3142_v4 = vld [vmem:[#allocation122_spill] sm:$0xff]  ;;  %v3143_v46 = vld [vmem:[#allocation125_spill] sm:$0xff] }
 0x2be   : > { %1881 = vmatpush1.bf16.msra.mxu0 %v1880_v1  ;;  %1909 = vmatpush3.bf16.msra.mxu1 %v1908_v43  ;;  %v1914_v1 = vpack.c.bf16 %v3131_v59, %v3130_v38  ;;  %v1890_v43 = vpack.c.bf16 %v3133_v49, %v3132_v60  ;;  %v3145_v49 = vrot.slane %v2592_v56, %v2607_v48 }
 0x2bf   : > { %1883 = vmatprep.subr.bf16.mxu0 %v1882_v2  ;;  %1910 = vmatprep.subr.bf16.mxu1 %v3106_v47  ;;  %v1892_v2 = vpack.c.bf16 %v3135_v63, %v3134_v52  ;;  %v3146_v63 = vrot.slane %v2592_v56, %v2587_v50 }
 0x2c2   : > { %1885 = vmatpush1.bf16.msra.mxu0 %v1884_v51  ;;  %1912 = vmatpush3.bf16.msra.mxu1 %v1911_v53  ;;  %v1917_v51 = vpack.c.bf16 %v3137_v55, %v3136_v3  ;;  %v1894_v53 = vpack.c.bf16 %v3139_v61, %v3138_v57 }
 0x2c3   : > { %1887 = vmatprep.subr.bf16.mxu0 %v1886_v58  ;;  %1913 = vmatprep.subr.bf16.mxu1 %v3106_v47  ;;  %v1896_v58 = vpack.c.bf16 %v3141_v45, %v3140_v62  ;;  %v3148_v45 = vrot.slane %v2597_v44, %v2607_v48 }
 0x2c6   : > { %1889 = vmatpush1.bf16.msra.mxu0 %v1888_v54  ;;  %1915 = vmatpush3.bf16.msra.mxu1 %v1914_v1  ;;  %v1920_v54 = vpack.c.bf16 %v3143_v46, %v3142_v4  ;;  %v3144_v1 = vrot.slane %v2592_v56, %v2585_v41 }
 0x2c7   : > { %1916 = vmatprep.subr.bf16.mxu1 %v3106_v47  ;;  %1891 = vmatprep.subr.bf16.mxu0 %v1890_v43 }
 0x2ca   : > { %1893 = vmatpush1.bf16.msra.mxu0 %v1892_v2  ;;  %1918 = vmatpush3.bf16.msra.mxu1 %v1917_v51 }
 0x2cb   : > { %1919 = vmatprep.subr.bf16.mxu1 %v3106_v47  ;;  %1895 = vmatprep.subr.bf16.mxu0 %v1894_v53  ;;  %v3147_v53 = vrot.slane %v2597_v44, %v2585_v41 }
 0x2ce   : > { %1897 = vmatpush1.bf16.msra.mxu0 %v1896_v58  ;;  %1921 = vmatpush3.bf16.msra.mxu1 %v1920_v54 }
 0x384   : > { %v826_v38 = vpop.f32.mrb[2].mxu0  ;;  %v897_v59 = vpop.f32.mrb[2].mxu1 }
 0x385   : > { %v827_v60 = vadd.f32 %v826_v38, %v3144_v1  ;;  %v898_v47 = vadd.f32 %v897_v59, %v3145_v49  ;;  %v828_v43 = vpop.f32.mrb[3].mxu0  ;;  %v1586_v52 = vpop.f32.mrb[3].mxu1  ;;  %v1080_v49 = vld [vmem:[#allocation12 + $0x8] sm:$0xff] (%p602_p12) }
 0x386   : > { %v829_v2 = vadd.f32 %v828_v43, %v3146_v63  ;;  %v1082_v52 = vld [vmem:[#allocation12 + $0x18] sm:$0xff] (%p602_p12) }
 0x387   : > { %v902_v3 = vmul.f32 %v898_v47, %v2780_v0  ;;  %v3149_v0 = vrot.slane %v2597_v44, %v2587_v50  ;;  %v1081_v47 = vld [vmem:[#allocation12 + $0x10] sm:$0xff] (%p602_p12) }
 0x388   : > { %v901_v55 = vmul.f32 %v829_v2, %v827_v60  ;;  %v1079_v60 = vld [vmem:[#allocation12] sm:$0xff] (%p602_p12)  ;;  %v1926_v63 = vpack.c.bf16 (%p602_p12), %v1082_v52, %v1081_v47 }
 0x389   :  { %v1922_v43 = vpack.c.bf16 (%p602_p12), %v1080_v49, %v1079_v60  ;;  %v1083_v2 = vld [vmem:[#allocation12 + $0x20] sm:$0xff] (%p602_p12) }
 0x38a   : > { %v903_v51 = vadd.f32 %v902_v3, %v901_v55  ;;  %v1084_v3 = vld [vmem:[#allocation12 + $0x28] sm:$0xff] (%p602_p12) }
 0x38b   :  { %1923 = vmatprep.subr.bf16.mxu0 (%p602_p12), %v1922_v43  ;;  %1954 = vmatprep.subr.bf16.mxu1 (%p602_p12), %v1922_v43  ;;  %v1930_v55 = vpack.c.bf16 (%p602_p12), %v1084_v3, %v1083_v2 }
 0x38c   : > { %1353 = vst [vmem:[%s2784_s30 + $0x40] sm:$0xff] %v903_v51  ;;  %972 = vmatmul.mubr.f32.vlgmr.msra.gmra.mrb[4].mxu0 %v903_v51  ;;  %1620 = vmatmul.mubr.f32.vlgmr.msra.gmra.mrb[4].mxu1 %v903_v51 }
 0x38d   :  { %1925 = vmatpush3.bf16.msra.mxu0 (%p602_p12), %v1922_v43  ;;  %1962 = vmatpush3.bf16.msra.mxu1 (%p602_p12), %v1922_v43 }
 0x38e   :  { %1927 = vmatprep.subr.bf16.mxu0 (%p602_p12), %v1926_v63  ;;  %1955 = vmatprep.subr.bf16.mxu1 (%p602_p12), %v1926_v63 }
 0x391   :  { %1929 = vmatpush3.bf16.msra.mxu0 (%p602_p12), %v1926_v63  ;;  %1963 = vmatpush3.bf16.msra.mxu1 (%p602_p12), %v1926_v63 }
 0x392   :  { %1931 = vmatprep.subr.bf16.mxu0 (%p602_p12), %v1930_v55  ;;  %1956 = vmatprep.subr.bf16.mxu1 (%p602_p12), %v1930_v55 }
 0x395   :  { %1933 = vmatpush3.bf16.msra.mxu0 (%p602_p12), %v1930_v55  ;;  %1964 = vmatpush3.bf16.msra.mxu1 (%p602_p12), %v1930_v55 }
 0x45f   : > { %v973_v57 = vpop.f32.mrb[4].mxu0  ;;  %v1044_v61 = vpop.f32.mrb[4].mxu1 }
 0x460   : > { %v974_v62 = vadd.f32 %v973_v57, %v3147_v53  ;;  %v1045_v58 = vadd.f32 %v1044_v61, %v3148_v45  ;;  %v975_v4 = vpop.f32.mrb[5].mxu0  ;;  %v1621_v46 = vpop.f32.mrb[5].mxu1  ;;  %v1085_v57 = vld [vmem:[#allocation12 + $0x30] sm:$0xff] (%p602_p12)  ;;  %v1086_v61 = vld [vmem:[#allocation12 + $0x38] sm:$0xff] (%p602_p12) }
 0x461   : > { %v976_v54 = vadd.f32 %v975_v4, %v3149_v0  ;;  %604 = sbr.rel (!%p602_p12) target bundleno = 435 (0x1b3), region = 91  ;;  %v1934_v5 = vpack.c.bf16 (%p602_p12), %v1086_v61, %v1085_v57 }
 0x462   : > { %v1049_v38 = vmul.f32 %v1045_v58, %v903_v51 }
 0x463   : > { %v1048_v59 = vmul.f32 %v976_v54, %v974_v62  ;;  %1935 = vmatprep.subr.bf16.mxu0 (%p602_p12), %v1934_v5  ;;  %1957 = vmatprep.subr.bf16.mxu1 (%p602_p12), %v1934_v5 }
 0x464   :  { %1937 = vmatpush3.bf16.msra.mxu0 (%p602_p12), %v1934_v5  ;;  %1965 = vmatpush3.bf16.msra.mxu1 (%p602_p12), %v1934_v5 }
 0x465   : > { %v1050_v1 = vadd.f32 %v1049_v38, %v1048_v59   ;;  %1939 = vmatprep.subr.bf16.mxu0 (%p602_p12), %v1938_v8  ;;  %1958 = vmatprep.subr.bf16.mxu1 (%p602_p12), %v1938_v8 }
 0x467   : > { %1355 = vst [vmem:[%s2784_s30 + $0x80] sm:$0xff] %v1050_v1 }
 0x468   :  { %1941 = vmatpush3.bf16.msra.mxu0 %v1938_v8  ;;  %1966 = vmatpush3.bf16.msra.mxu1 %v1938_v8 }
 0x469   :  { %1943 = vmatprep.subr.bf16.mxu0 %v1942_v11  ;;  %1959 = vmatprep.subr.bf16.mxu1 %v1942_v11 }
 0x46c   :  { %1945 = vmatpush3.bf16.msra.mxu0 %v1942_v11  ;;  %1967 = vmatpush3.bf16.msra.mxu1 %v1942_v11 }
 0x46d   :  { %1947 = vmatprep.subr.bf16.mxu0 %v1946_v14  ;;  %1960 = vmatprep.subr.bf16.mxu1 %v1946_v14 }
 0x46e   :  { %v1055_v51 = vld [vmem:[#allocation13] sm:$0xff]  ;;  %v1056_v18 = vld [vmem:[#allocation13 + $0x8] sm:$0xff]  ;;  %v1057_v20 = vld [vmem:[#allocation13 + $0x10] sm:$0xff] }
 0x46f   :  { %v1067_v1 = vld [vmem:[#allocation13 + $0x60] sm:$0xff]  ;;  %1654 = vmatprep.mubr.f32.mxu0 %v1055_v51  ;;  %v1068_v19 = vld [vmem:[#allocation13 + $0x68] sm:$0xff]  ;;  %v1069_v21 = vld [vmem:[#allocation13 + $0x70] sm:$0xff] }
 0x470   :  { %1672 = vmatprep.mubr.f32.mxu1 %v1067_v1  ;;  %1949 = vmatpush3.bf16.msra.mxu0 %v1946_v14  ;;  %v1058_v22 = vld [vmem:[#allocation13 + $0x18] sm:$0xff]  ;;  %v1059_v24 = vld [vmem:[#allocation13 + $0x20] sm:$0xff]  ;;  %v1060_v26 = vld [vmem:[#allocation13 + $0x28] sm:$0xff] }
 0x471   :  { %1968 = vmatpush3.bf16.msra.mxu1 %v1946_v14  ;;  %1951 = vmatprep.subr.bf16.mxu0 %v1950_v17  ;;  %v1070_v23 = vld [vmem:[#allocation13 + $0x78] sm:$0xff]  ;;  %v1071_v25 = vld [vmem:[#allocation13 + $0x80] sm:$0xff]  ;;  %v1072_v27 = vld [vmem:[#allocation13 + $0x88] sm:$0xff] }
 0x472   :  { %1961 = vmatprep.subr.bf16.mxu1 %v1950_v17  ;;  %v1061_v28 = vld [vmem:[#allocation13 + $0x30] sm:$0xff]  ;;  %v1062_v30 = vld [vmem:[#allocation13 + $0x38] sm:$0xff]  ;;  %v1063_v32 = vld [vmem:[#allocation13 + $0x40] sm:$0xff] }
 0x473   :  { %v1073_v29 = vld [vmem:[#allocation13 + $0x90] sm:$0xff]  ;;  %v1074_v31 = vld [vmem:[#allocation13 + $0x98] sm:$0xff]  ;;  %v1075_v33 = vld [vmem:[#allocation13 + $0xa0] sm:$0xff] }
 0x474   :  { %1953 = vmatpush3.bf16.msra.mxu0 %v1950_v17  ;;  %v1064_v34 = vld [vmem:[#allocation13 + $0x48] sm:$0xff]  ;;  %v1065_v36 = vld [vmem:[#allocation13 + $0x50] sm:$0xff]  ;;  %v1066_v39 = vld [vmem:[#allocation13 + $0x58] sm:$0xff] }
 0x475   :  { %1969 = vmatpush3.bf16.msra.mxu1 %v1950_v17  ;;  %v1076_v35 = vld [vmem:[#allocation13 + $0xa8] sm:$0xff]  ;;  %v1077_v37 = vld [vmem:[#allocation13 + $0xb0] sm:$0xff]  ;;  %v1078_v40 = vld [vmem:[#allocation13 + $0xb8] sm:$0xff] }
 0x477   :  { %1655 = vmatmul.mubr.f32.vlgmr.msra.gmra.mrb[0].mxu0 %v1056_v18 }
 0x478   :  { %1673 = vmatmul.mubr.f32.vlgmr.msra.gmra.mrb[0].mxu1 %v1068_v19  ;;  %1657 = vmatprep.mubr.f32.mxu0 %v1057_v20 }
 0x479   :  { %1675 = vmatprep.mubr.f32.mxu1 %v1069_v21 }
 0x47b   :  { %1658 = vmatmul.mubr.f32.gmra.mrb[2].mxu0 %v1058_v22 }
 0x47c   :  { %1676 = vmatmul.mubr.f32.gmra.mrb[2].mxu1 %v1070_v23  ;;  %1660 = vmatprep.mubr.f32.mxu0 %v1059_v24 }
 0x47d   :  { %1678 = vmatprep.mubr.f32.mxu1 %v1071_v25 }
 0x47f   :  { %1661 = vmatmul.mubr.f32.gmra.mrb[4].mxu0 %v1060_v26 }
 0x480   :  { %1679 = vmatmul.mubr.f32.gmra.mrb[4].mxu1 %v1072_v27  ;;  %1663 = vmatprep.mubr.f32.mxu0 %v1061_v28 }
 0x481   :  { %1681 = vmatprep.mubr.f32.mxu1 %v1073_v29 }
 0x483   :  { %1664 = vmatmul.mubr.f32.gmra.mrb[6].mxu0 %v1062_v30 }
 0x484   :  { %1682 = vmatmul.mubr.f32.gmra.mrb[6].mxu1 %v1074_v31  ;;  %1666 = vmatprep.mubr.f32.mxu0 %v1063_v32 }
 0x485   :  { %1684 = vmatprep.mubr.f32.mxu1 %v1075_v33 }
 0x487   :  { %1667 = vmatmul.mubr.f32.gmra.mrb[8].mxu0 %v1064_v34 }
 0x488   :  { %1685 = vmatmul.mubr.f32.gmra.mrb[8].mxu1 %v1076_v35  ;;  %1669 = vmatprep.mubr.f32.mxu0 %v1065_v36 }
 0x489   :  { %1687 = vmatprep.mubr.f32.mxu1 %v1077_v37 }
 0x48b   :  { %1670 = vmatmul.mubr.f32.gmra.mrb[10].mxu0 %v1066_v39 }
 0x48c   :  { %1688 = vmatmul.mubr.f32.gmra.mrb[10].mxu1 %v1078_v40 }
 0x54a   :  { %v1656_v41 = vpop.f32.mrb[0].mxu0 }
 0x54b   :  { %v1674_v50 = vpop.f32.mrb[0].mxu1  ;;  %v1174_v56 = vadd.f32 %v1656_v41, %v2869_v42  ;;  %v1168_v48 = vpop.f32.mrb[1].mxu0 }
 0x54c   :  { %v1234_v44 = vadd.f32 %v1674_v50, %v2869_v42  ;;  %v1228_v53 = vpop.f32.mrb[1].mxu1  ;;  %v1169_v62 = vadd.f32 %v2869_v42, %v1168_v48 }
 0x54d   :  { %v1229_v45 = vadd.f32 %v2869_v42, %v1228_v53  ;;  %1288 = vst [vmem:[#allocation13 + $0x8] sm:$0xff] %v1174_v56 }
 0x54e   :  { %1300 = vst [vmem:[#allocation13 + $0x68] sm:$0xff] %v1234_v44  ;;  %1287 = vst [vmem:[#allocation13] sm:$0xff] %v1169_v62  ;;  %v1659_v58 = vpop.f32.mrb[2].mxu0 }
 0x54f   :  { %1299 = vst [vmem:[#allocation13 + $0x60] sm:$0xff] %v1229_v45  ;;  %v1677_v4 = vpop.f32.mrb[2].mxu1  ;;  %v1184_v46 = vadd.f32 %v1659_v58, %v2869_v42  ;;  %v1178_v54 = vpop.f32.mrb[3].mxu0 }
 0x550   :  { %v1244_v0 = vadd.f32 %v1677_v4, %v2869_v42  ;;  %v1238_v38 = vpop.f32.mrb[3].mxu1  ;;  %v1179_v59 = vadd.f32 %v2869_v42, %v1178_v54 }
 0x551   :  { %v1239_v60 = vadd.f32 %v2869_v42, %v1238_v38  ;;  %1290 = vst [vmem:[#allocation13 + $0x18] sm:$0xff] %v1184_v46 }
 0x552   :  { %1302 = vst [vmem:[#allocation13 + $0x78] sm:$0xff] %v1244_v0  ;;  %1289 = vst [vmem:[#allocation13 + $0x10] sm:$0xff] %v1179_v59  ;;  %v1662_v49 = vpop.f32.mrb[4].mxu0 }
 0x553   :  { %1301 = vst [vmem:[#allocation13 + $0x70] sm:$0xff] %v1239_v60  ;;  %v1680_v47 = vpop.f32.mrb[4].mxu1  ;;  %v1194_v43 = vadd.f32 %v1662_v49, %v2869_v42  ;;  %v1188_v63 = vpop.f32.mrb[5].mxu0 }
 0x554   :  { %v1254_v52 = vadd.f32 %v1680_v47, %v2869_v42  ;;  %v1248_v2 = vpop.f32.mrb[5].mxu1  ;;  %v1189_v3 = vadd.f32 %v2869_v42, %v1188_v63 }
 0x555   :  { %v1249_v55 = vadd.f32 %v2869_v42, %v1248_v2  ;;  %1292 = vst [vmem:[#allocation13 + $0x28] sm:$0xff] %v1194_v43 }
 0x556   :  { %1304 = vst [vmem:[#allocation13 + $0x88] sm:$0xff] %v1254_v52  ;;  %1291 = vst [vmem:[#allocation13 + $0x20] sm:$0xff] %v1189_v3  ;;  %v1665_v51 = vpop.f32.mrb[6].mxu0 }
 0x557   :  { %1303 = vst [vmem:[#allocation13 + $0x80] sm:$0xff] %v1249_v55  ;;  %v1683_v1 = vpop.f32.mrb[6].mxu1  ;;  %v1204_v57 = vadd.f32 %v1665_v51, %v2869_v42  ;;  %v1198_v5 = vpop.f32.mrb[7].mxu0 }
 0x558   :  { %v1264_v61 = vadd.f32 %v1683_v1, %v2869_v42  ;;  %v1258_v6 = vpop.f32.mrb[7].mxu1  ;;  %v1199_v7 = vadd.f32 %v2869_v42, %v1198_v5 }
 0x559   :  { %v1259_v8 = vadd.f32 %v2869_v42, %v1258_v6  ;;  %1294 = vst [vmem:[#allocation13 + $0x38] sm:$0xff] %v1204_v57 }
 0x55a   :  { %1306 = vst [vmem:[#allocation13 + $0x98] sm:$0xff] %v1264_v61  ;;  %1293 = vst [vmem:[#allocation13 + $0x30] sm:$0xff] %v1199_v7  ;;  %v1668_v9 = vpop.f32.mrb[8].mxu0 }
 0x55b   :  { %1305 = vst [vmem:[#allocation13 + $0x90] sm:$0xff] %v1259_v8  ;;  %v1686_v10 = vpop.f32.mrb[8].mxu1  ;;  %v1214_v11 = vadd.f32 %v1668_v9, %v2869_v42  ;;  %v1208_v13 = vpop.f32.mrb[9].mxu0 }
 0x55c   :  { %v1274_v12 = vadd.f32 %v1686_v10, %v2869_v42  ;;  %v1268_v14 = vpop.f32.mrb[9].mxu1  ;;  %v1209_v15 = vadd.f32 %v2869_v42, %v1208_v13 }
 0x55d   :  { %v1269_v16 = vadd.f32 %v2869_v42, %v1268_v14  ;;  %1296 = vst [vmem:[#allocation13 + $0x48] sm:$0xff] %v1214_v11 }
 0x55e   :  { %1308 = vst [vmem:[#allocation13 + $0xa8] sm:$0xff] %v1274_v12  ;;  %1295 = vst [vmem:[#allocation13 + $0x40] sm:$0xff] %v1209_v15  ;;  %v1671_v17 = vpop.f32.mrb[10].mxu0 }
 0x55f   :  { %1307 = vst [vmem:[#allocation13 + $0xa0] sm:$0xff] %v1269_v16  ;;  %v1689_v18 = vpop.f32.mrb[10].mxu1  ;;  %v1224_v19 = vadd.f32 %v1671_v17, %v2869_v42  ;;  %v1218_v21 = vpop.f32.mrb[11].mxu0 }
 0x560   :  { %v1284_v20 = vadd.f32 %v1689_v18, %v2869_v42  ;;  %v1278_v22 = vpop.f32.mrb[11].mxu1  ;;  %v1219_v23 = vadd.f32 %v2869_v42, %v1218_v21 }
 0x561   :  { %v1279_v24 = vadd.f32 %v2869_v42, %v1278_v22  ;;  %1298 = vst [vmem:[#allocation13 + $0x58] sm:$0xff] %v1224_v19 }
 0x562   :  { %1310 = vst [vmem:[#allocation13 + $0xb8] sm:$0xff] %v1284_v20  ;;  %1297 = vst [vmem:[#allocation13 + $0x50] sm:$0xff] %v1219_v23 }
 0x563   :  { %1309 = vst [vmem:[#allocation13 + $0xb0] sm:$0xff] %v1279_v24 }
 0x564   :  { %2121 = shalt.err (!%p2118_p3)
}
 0x565   :  { %s2122_s13 = scalar_lea.hbm %s2918_s8, 3072 }
 0x566   :  { %p2123_p4 = scmp.ne.s32.totalorder %s2918_s8, %s2122_s13  ;;  %p2126_p5 = scmp.lt.u32.totalorder %s2122_s13, %s2918_s8 }
 0x568   :  { %p2128_p6 = pnand %p2126_p5, %p2123_p4 }
 0x56a   :  { %2131 = shalt.err (!%p2128_p6)
}
 0x56b   :  { %1322 = dma.vmem_to_hbm [thread:$0]  %s1317_s11, 3072, %s2918_s8, [#allocation6], %s2161_s4, %s2161_s4, %s2162_s18  }
 0x56c   :  { %2146 = dma.done.wait [#allocation6], 3072  }
 0x56d   :  { %2147 = vsyncadd [#allocation6], 4294964224 }
 0x56e   :  { %1326 = vsyncpa [#allocation5], 1 }
 0x56f   :  { %1327 = vsyncpa [#allocation8], 1 }
 0x570   :  { %1328 = vsyncpa [#allocation11], 1 }
 0x571   :  { %1329 = vsyncpa [#allocation6], 1 }

</bundles_post_ra>
